<compile_context>
chip_gen: v5e
topology: v5e:2x2
jax: 0.10.0
libtpu: 0.0.40
codegen_flags: <defaults>
</compile_context>

<pallas_src>
import functools

import jax
import jax.numpy as jnp
import numpy as np
from jax.experimental import pallas as pl
from jax.experimental.pallas import tpu as pltpu


# ----------------------------------------------------------------------------
# Fused Pallas kernel: qkv projection + multi-head softmax attention + proj
# ----------------------------------------------------------------------------
def _pvt_attn_kernel(num_heads, x_ref, wqkv_ref, wp_ref, bp_ref, o_ref):
    bb, N, C = x_ref.shape                                             # bb batches / step
    dh = C // num_heads

    # One full-width projection for all batches in this block: (bb*N, C) @ (C, 3C).
    x = x_ref[...].reshape(bb * N, C).astype(jnp.bfloat16)
    qkv = jnp.dot(x, wqkv_ref[...], preferred_element_type=jnp.float32)  # (bb*N, 3C) f32

    wp = wp_ref[...]                                                   # (C, C) bf16, resident
    # Hoisted (JAX does not CSE broadcast_in_dim): fused proj bias as the acc seed.
    bias = jnp.broadcast_to(bp_ref[...], (N, C)).astype(jnp.float32)   # (N, C)

    for b in range(bb):                                                # static, bb in {1, 2}
        rows = slice(b * N, (b + 1) * N)
        q = qkv[rows, 0 * C:1 * C]                                     # (N, C) f32
        k = qkv[rows, 1 * C:2 * C]
        v = qkv[rows, 2 * C:3 * C]
        acc = bias

        # TODO(synk): for larger num_heads (e.g. PVT stage-4 nh=8, C=512) convert this
        # static unroll to lax.fori_loop(..., unroll=True) / a grid axis to bound vreg
        # live ranges, and add flash-style N/KV tiling before scaling N (v7x VMEM).
        for h in range(num_heads):
            cols = slice(h * dh, (h + 1) * dh)
            qh = q[:, cols].astype(jnp.bfloat16)                       # (N, dh)
            kh = k[:, cols].astype(jnp.bfloat16)
            vh = v[:, cols].astype(jnp.bfloat16)

            # QK^T as a transposed contraction (no explicit XLU transpose of K).
            # qk scale is already folded into Wq.
            logits = jax.lax.dot_general(
                qh, kh, (((1,), (1,)), ((), ())),
                preferred_element_type=jnp.float32)                    # (N, N) f32

            m = jnp.max(logits, axis=-1, keepdims=True)
            e = jnp.exp(logits - m)                                    # single exp per tile
            denom = jnp.sum(e, axis=-1, keepdims=True)

            # Deferred normalization: scale the (N, dh) context, not the (N, N) probs.
            ctx = jnp.dot(e.astype(jnp.bfloat16), vh,
                          preferred_element_type=jnp.float32)          # (N, dh)
            ctx = ctx * pl.reciprocal(denom, approx=True)

            # Fused output projection:
            #   concat_h(ctx_h) @ Wp.T == sum_h ctx_h @ Wp.T[h*dh:(h+1)*dh, :]
            acc = acc + jnp.dot(ctx.astype(jnp.bfloat16), wp[cols, :],
                                preferred_element_type=jnp.float32)

        o_ref[b] = acc                                                 # lane-dense (N, C)


def _tensorcores_per_chip():
    """Heuristic: 2 TCs per device on v7x / v4 / v5p (megacore), else 1."""
    try:
        kind = jax.devices()[0].device_kind.lower()
    except Exception:
        return 1
    return 2 if any(t in kind for t in ("v7", "v4", "v5p")) else 1


def attention_from_pvt_forward(params, x, H, W):
    """x: (B, N, C) with N == H*W. Returns (B, N, C) float32."""
    B, N, C = x.shape
    num_heads = params["num_heads"]
    assert N == H * W and C == params["dim"]
    # TODO(synk): sr_ratio > 1 branch (nn.Conv2d spatial reduction + nn.LayerNorm) not
    # implemented; module is used with its default sr_ratio=1 here.
    assert params["sr_ratio"] == 1

    # Device-aware grid: split batches across TCs where there are 2; otherwise run one
    # grid step over all batches (bigger M for the projection matmul, no per-step cost).
    cores = _tensorcores_per_chip()
    n_steps = cores if (cores > 1 and B % cores == 0) else 1
    bb = B // n_steps

    kernel = functools.partial(_pvt_attn_kernel, num_heads)
    return pl.pallas_call(
        kernel,
        out_shape=jax.ShapeDtypeStruct((B, N, C), jnp.float32),
        grid=(n_steps,),
        in_specs=[
            pl.BlockSpec((bb, N, C), lambda i: (i, 0, 0)),       # x  (per-step batch block)
            pl.BlockSpec((C, 3 * C), lambda i: (0, 0)),          # [scale*Wq | Wkv].T  bf16, resident
            pl.BlockSpec((C, C), lambda i: (0, 0)),              # Wp.T                bf16, resident
            pl.BlockSpec((1, C), lambda i: (0, 0)),              # proj bias           f32
        ],
        out_specs=pl.BlockSpec((bb, N, C), lambda i: (i, 0, 0)),
        compiler_params=pltpu.CompilerParams(dimension_semantics=("parallel",)),
    )(x, params["wqkv_t_bf16"], params["wp_t_bf16"], params["bp_row"])


# ----------------------------------------------------------------------------
# Pure-JAX reference (mirrors the torch forward op-by-op, sr_ratio == 1)
# ----------------------------------------------------------------------------
def attention_from_pvt_ref(params, x, H, W):
    B, N, C = x.shape
    nh = params["num_heads"]
    dh = C // nh
    scale = params["scale"]

    q = (x @ params["wq"].T).reshape(B, N, nh, dh).transpose(0, 2, 1, 3)      # (B,h,N,dh)
    kv = (x @ params["wkv"].T).reshape(B, N, 2, nh, dh).transpose(2, 0, 3, 1, 4)
    k, v = kv[0], kv[1]                                                        # (B,h,N,dh)
    attn = jnp.einsum("bhnd,bhmd->bhnm", q, k) * scale
    attn = jax.nn.softmax(attn, axis=-1)                                       # attn_drop p=0
    ctx = jnp.einsum("bhnm,bhmd->bhnd", attn, v)
    ctx = ctx.transpose(0, 2, 1, 3).reshape(B, N, C)
    return ctx @ params["wp"].T + params["bp"]                                 # proj_drop p=0


# ----------------------------------------------------------------------------
# Deterministic parameter init (trunc_normal std=0.02; qkv_bias=False default)
# + one-time kernel-side weight prep (fused/scaled/transposed/bf16).
# ----------------------------------------------------------------------------
def init_params(key, dim, num_heads, qk_scale=None, sr_ratio=1):
    assert dim % num_heads == 0
    head_dim = dim // num_heads
    scale = qk_scale or head_dim ** (-0.5)
    kq, kkv, kp, kb = jax.random.split(key, 4)
    wq = 0.02 * jax.random.truncated_normal(kq, -2.0, 2.0, (dim, dim), jnp.float32)
    wkv = 0.02 * jax.random.truncated_normal(kkv, -2.0, 2.0, (2 * dim, dim), jnp.float32)
    wp = 0.02 * jax.random.truncated_normal(kp, -2.0, 2.0, (dim, dim), jnp.float32)
    bp = 0.02 * jax.random.normal(kb, (dim,), jnp.float32)
    params = dict(wq=wq, wkv=wkv, wp=wp, bp=bp,
                  num_heads=num_heads, dim=dim, scale=scale, sr_ratio=sr_ratio)

    # One-time kernel weight prep (NOT a per-call wrapper op):
    #  - fold qk scale into Wq,
    #  - fuse [Wq | Wkv] into a single (C, 3C) right-multiplied matrix,
    #  - pre-transpose + bf16 for MXU feeding.
    wqkv_t = jnp.concatenate([(scale * wq).T, wkv.T], axis=1)                  # (C, 3C)
    params["wqkv_t_bf16"] = wqkv_t.astype(jnp.bfloat16)
    params["wp_t_bf16"] = wp.T.astype(jnp.bfloat16)
    params["bp_row"] = bp.reshape(1, dim)
    return params


# ----------------------------------------------------------------------------
if __name__ == "__main__":
    key = jax.random.PRNGKey(0)
    B = 2
    H = W = 8
    N = H * W                    # 64 tokens
    dim = 128                    # lane-dense channel dim (C == 128 lanes)
    num_heads = 2                # dh = 64 (PVT stage-2-like config), sr_ratio = 1

    k_param, k_x = jax.random.split(key)
    params = init_params(k_param, dim=dim, num_heads=num_heads)
    x = jax.random.normal(k_x, (B, N, dim), jnp.float32)

    out = attention_from_pvt_forward(params, x, H, W)
    out = jax.block_until_ready(out)

    ref = attention_from_pvt_ref(params, x, H, W)
    # bf16 MXU inputs (f32 accumulation) + approx reciprocal => loose-but-tight tolerance.
    np.testing.assert_allclose(np.asarray(out), np.asarray(ref), rtol=2e-2, atol=3e-3)

    print("KERNEL_OK")
</pallas_src>

<mosaic_0001>
module attributes {stable_mosaic.version = 11 : i64} {
  func.func @_pvt_attn_kernel(%arg0: i32, %arg1: memref<2x64x128xf32, #tpu.memory_space<vmem>>, %arg2: memref<128x384xbf16, #tpu.memory_space<vmem>>, %arg3: memref<128x128xbf16, #tpu.memory_space<vmem>>, %arg4: memref<1x128xf32, #tpu.memory_space<vmem>>, %arg5: memref<2x64x128xf32, #tpu.memory_space<vmem>>) attributes {dimension_semantics = [#tpu.dimension_semantics<parallel>], iteration_bounds = array<i64: 1>, scalar_prefetch = 0 : i64, scratch_operands = 0 : i64, tpu.core_type = #tpu.core_type<tc>, window_params = [{transform_indices = @transform_0, window_bounds = array<i64: 2, 64, 128>}, {pipeline_mode = #tpu.pipeline_mode<synchronous>, transform_indices = @transform_1, window_bounds = array<i64: 128, 384>}, {pipeline_mode = #tpu.pipeline_mode<synchronous>, transform_indices = @transform_2, window_bounds = array<i64: 128, 128>}, {pipeline_mode = #tpu.pipeline_mode<synchronous>, transform_indices = @transform_3, window_bounds = array<i64: 1, 128>}, {transform_indices = @transform_4, window_bounds = array<i64: 2, 64, 128>}]} {
    %c0 = arith.constant 0 : index
    %c0_0 = arith.constant 0 : index
    %c0_1 = arith.constant 0 : index
    %0 = vector.load %arg1[%c0, %c0_0, %c0_1] : memref<2x64x128xf32, #tpu.memory_space<vmem>>, vector<2x64x128xf32>
    %1 = vector.shape_cast %0 : vector<2x64x128xf32> to vector<128x128xf32>
    %2 = arith.truncf %1 : vector<128x128xf32> to vector<128x128xbf16>
    %c0_2 = arith.constant 0 : index
    %c0_3 = arith.constant 0 : index
    %3 = vector.load %arg2[%c0_2, %c0_3] : memref<128x384xbf16, #tpu.memory_space<vmem>>, vector<128x384xbf16>
    %cst = arith.constant dense<0.000000e+00> : vector<128x384xf32>
    %4 = tpu.matmul %2, %3, %cst {dimension_numbers = #tpu.dot_dimension_numbers<[1], [0], [0], [1], [0, 0, 1, 1], [], []>} : vector<128x128xbf16>, vector<128x384xbf16>, vector<128x384xf32> -> vector<128x384xf32>
    %c0_4 = arith.constant 0 : index
    %c0_5 = arith.constant 0 : index
    %5 = vector.load %arg3[%c0_4, %c0_5] : memref<128x128xbf16, #tpu.memory_space<vmem>>, vector<128x128xbf16>
    %c0_6 = arith.constant 0 : index
    %c0_7 = arith.constant 0 : index
    %6 = vector.load %arg4[%c0_6, %c0_7] : memref<1x128xf32, #tpu.memory_space<vmem>>, vector<1x128xf32>
    %7 = vector.shape_cast %6 : vector<1x128xf32> to vector<1x128xf32>
    %8 = vector.broadcast %7 : vector<1x128xf32> to vector<64x128xf32>
    %9 = vector.extract_strided_slice %4 {offsets = [0, 0], sizes = [64, 128], strides = [1, 1]} : vector<128x384xf32> to vector<64x128xf32>
    %10 = vector.extract_strided_slice %4 {offsets = [0, 128], sizes = [64, 128], strides = [1, 1]} : vector<128x384xf32> to vector<64x128xf32>
    %11 = vector.extract_strided_slice %4 {offsets = [0, 256], sizes = [64, 128], strides = [1, 1]} : vector<128x384xf32> to vector<64x128xf32>
    %12 = vector.extract_strided_slice %9 {offsets = [0, 0], sizes = [64, 64], strides = [1, 1]} : vector<64x128xf32> to vector<64x64xf32>
    %13 = arith.truncf %12 : vector<64x64xf32> to vector<64x64xbf16>
    %14 = vector.extract_strided_slice %10 {offsets = [0, 0], sizes = [64, 64], strides = [1, 1]} : vector<64x128xf32> to vector<64x64xf32>
    %15 = arith.truncf %14 : vector<64x64xf32> to vector<64x64xbf16>
    %16 = vector.extract_strided_slice %11 {offsets = [0, 0], sizes = [64, 64], strides = [1, 1]} : vector<64x128xf32> to vector<64x64xf32>
    %17 = arith.truncf %16 : vector<64x64xf32> to vector<64x64xbf16>
    %cst_8 = arith.constant dense<0.000000e+00> : vector<64x64xf32>
    %18 = tpu.matmul %13, %15, %cst_8 {dimension_numbers = #tpu.dot_dimension_numbers<[1], [1], [0], [0], [0, 0, 1, 0], [], []>} : vector<64x64xbf16>, vector<64x64xbf16>, vector<64x64xf32> -> vector<64x64xf32>
    %cst_9 = arith.constant dense<0xFF800000> : vector<64xf32>
    %19 = vector.multi_reduction <maximumf>, %18, %cst_9 [1] : vector<64x64xf32> to vector<64xf32>
    %20 = vector.shape_cast %19 : vector<64xf32> to vector<64x1xf32>
    %21 = vector.broadcast %20 : vector<64x1xf32> to vector<64x64xf32>
    %22 = arith.subf %18, %21 : vector<64x64xf32>
    %23 = math.exp %22 : vector<64x64xf32>
    %cst_10 = arith.constant dense<0.000000e+00> : vector<64xf32>
    %24 = vector.multi_reduction <add>, %23, %cst_10 [1] : vector<64x64xf32> to vector<64xf32>
    %25 = vector.shape_cast %24 : vector<64xf32> to vector<64x1xf32>
    %26 = arith.truncf %23 : vector<64x64xf32> to vector<64x64xbf16>
    %cst_11 = arith.constant dense<0.000000e+00> : vector<64x64xf32>
    %27 = tpu.matmul %26, %17, %cst_11 {dimension_numbers = #tpu.dot_dimension_numbers<[1], [0], [0], [1], [0, 0, 1, 1], [], []>} : vector<64x64xbf16>, vector<64x64xbf16>, vector<64x64xf32> -> vector<64x64xf32>
    %28 = tpu.reciprocal %25 {approx = true} : vector<64x1xf32> -> vector<64x1xf32>
    %29 = vector.broadcast %28 : vector<64x1xf32> to vector<64x64xf32>
    %30 = arith.mulf %27, %29 : vector<64x64xf32>
    %31 = arith.truncf %30 : vector<64x64xf32> to vector<64x64xbf16>
    %32 = vector.extract_strided_slice %5 {offsets = [0, 0], sizes = [64, 128], strides = [1, 1]} : vector<128x128xbf16> to vector<64x128xbf16>
    %cst_12 = arith.constant dense<0.000000e+00> : vector<64x128xf32>
    %33 = tpu.matmul %31, %32, %cst_12 {dimension_numbers = #tpu.dot_dimension_numbers<[1], [0], [0], [1], [0, 0, 1, 1], [], []>} : vector<64x64xbf16>, vector<64x128xbf16>, vector<64x128xf32> -> vector<64x128xf32>
    %34 = arith.addf %8, %33 : vector<64x128xf32>
    %35 = vector.extract_strided_slice %9 {offsets = [0, 64], sizes = [64, 64], strides = [1, 1]} : vector<64x128xf32> to vector<64x64xf32>
    %36 = arith.truncf %35 : vector<64x64xf32> to vector<64x64xbf16>
    %37 = vector.extract_strided_slice %10 {offsets = [0, 64], sizes = [64, 64], strides = [1, 1]} : vector<64x128xf32> to vector<64x64xf32>
    %38 = arith.truncf %37 : vector<64x64xf32> to vector<64x64xbf16>
    %39 = vector.extract_strided_slice %11 {offsets = [0, 64], sizes = [64, 64], strides = [1, 1]} : vector<64x128xf32> to vector<64x64xf32>
    %40 = arith.truncf %39 : vector<64x64xf32> to vector<64x64xbf16>
    %cst_13 = arith.constant dense<0.000000e+00> : vector<64x64xf32>
    %41 = tpu.matmul %36, %38, %cst_13 {dimension_numbers = #tpu.dot_dimension_numbers<[1], [1], [0], [0], [0, 0, 1, 0], [], []>} : vector<64x64xbf16>, vector<64x64xbf16>, vector<64x64xf32> -> vector<64x64xf32>
    %cst_14 = arith.constant dense<0xFF800000> : vector<64xf32>
    %42 = vector.multi_reduction <maximumf>, %41, %cst_14 [1] : vector<64x64xf32> to vector<64xf32>
    %43 = vector.shape_cast %42 : vector<64xf32> to vector<64x1xf32>
    %44 = vector.broadcast %43 : vector<64x1xf32> to vector<64x64xf32>
    %45 = arith.subf %41, %44 : vector<64x64xf32>
    %46 = math.exp %45 : vector<64x64xf32>
    %cst_15 = arith.constant dense<0.000000e+00> : vector<64xf32>
    %47 = vector.multi_reduction <add>, %46, %cst_15 [1] : vector<64x64xf32> to vector<64xf32>
    %48 = vector.shape_cast %47 : vector<64xf32> to vector<64x1xf32>
    %49 = arith.truncf %46 : vector<64x64xf32> to vector<64x64xbf16>
    %cst_16 = arith.constant dense<0.000000e+00> : vector<64x64xf32>
    %50 = tpu.matmul %49, %40, %cst_16 {dimension_numbers = #tpu.dot_dimension_numbers<[1], [0], [0], [1], [0, 0, 1, 1], [], []>} : vector<64x64xbf16>, vector<64x64xbf16>, vector<64x64xf32> -> vector<64x64xf32>
    %51 = tpu.reciprocal %48 {approx = true} : vector<64x1xf32> -> vector<64x1xf32>
    %52 = vector.broadcast %51 : vector<64x1xf32> to vector<64x64xf32>
    %53 = arith.mulf %50, %52 : vector<64x64xf32>
    %54 = arith.truncf %53 : vector<64x64xf32> to vector<64x64xbf16>
    %55 = vector.extract_strided_slice %5 {offsets = [64, 0], sizes = [64, 128], strides = [1, 1]} : vector<128x128xbf16> to vector<64x128xbf16>
    %cst_17 = arith.constant dense<0.000000e+00> : vector<64x128xf32>
    %56 = tpu.matmul %54, %55, %cst_17 {dimension_numbers = #tpu.dot_dimension_numbers<[1], [0], [0], [1], [0, 0, 1, 1], [], []>} : vector<64x64xbf16>, vector<64x128xbf16>, vector<64x128xf32> -> vector<64x128xf32>
    %57 = arith.addf %34, %56 : vector<64x128xf32>
    %c0_18 = arith.constant 0 : index
    %c0_19 = arith.constant 0 : index
    %c0_20 = arith.constant 0 : index
    %58 = vector.load %arg5[%c0_18, %c0_19, %c0_20] : memref<2x64x128xf32, #tpu.memory_space<vmem>>, vector<1x64x128xf32>
    %59 = vector.shape_cast %58 : vector<1x64x128xf32> to vector<64x128xf32>
    %60 = vector.shape_cast %57 : vector<64x128xf32> to vector<1x64x128xf32>
    tpu.vector_store %arg5[%c0_18, %c0_19, %c0_20], %60 {strides = array<i32>} : memref<2x64x128xf32, #tpu.memory_space<vmem>>, vector<1x64x128xf32>,
    %61 = vector.extract_strided_slice %4 {offsets = [64, 0], sizes = [64, 128], strides = [1, 1]} : vector<128x384xf32> to vector<64x128xf32>
    %62 = vector.extract_strided_slice %4 {offsets = [64, 128], sizes = [64, 128], strides = [1, 1]} : vector<128x384xf32> to vector<64x128xf32>
    %63 = vector.extract_strided_slice %4 {offsets = [64, 256], sizes = [64, 128], strides = [1, 1]} : vector<128x384xf32> to vector<64x128xf32>
    %64 = vector.extract_strided_slice %61 {offsets = [0, 0], sizes = [64, 64], strides = [1, 1]} : vector<64x128xf32> to vector<64x64xf32>
    %65 = arith.truncf %64 : vector<64x64xf32> to vector<64x64xbf16>
    %66 = vector.extract_strided_slice %62 {offsets = [0, 0], sizes = [64, 64], strides = [1, 1]} : vector<64x128xf32> to vector<64x64xf32>
    %67 = arith.truncf %66 : vector<64x64xf32> to vector<64x64xbf16>
    %68 = vector.extract_strided_slice %63 {offsets = [0, 0], sizes = [64, 64], strides = [1, 1]} : vector<64x128xf32> to vector<64x64xf32>
    %69 = arith.truncf %68 : vector<64x64xf32> to vector<64x64xbf16>
    %cst_21 = arith.constant dense<0.000000e+00> : vector<64x64xf32>
    %70 = tpu.matmul %65, %67, %cst_21 {dimension_numbers = #tpu.dot_dimension_numbers<[1], [1], [0], [0], [0, 0, 1, 0], [], []>} : vector<64x64xbf16>, vector<64x64xbf16>, vector<64x64xf32> -> vector<64x64xf32>
    %cst_22 = arith.constant dense<0xFF800000> : vector<64xf32>
    %71 = vector.multi_reduction <maximumf>, %70, %cst_22 [1] : vector<64x64xf32> to vector<64xf32>
    %72 = vector.shape_cast %71 : vector<64xf32> to vector<64x1xf32>
    %73 = vector.broadcast %72 : vector<64x1xf32> to vector<64x64xf32>
    %74 = arith.subf %70, %73 : vector<64x64xf32>
    %75 = math.exp %74 : vector<64x64xf32>
    %cst_23 = arith.constant dense<0.000000e+00> : vector<64xf32>
    %76 = vector.multi_reduction <add>, %75, %cst_23 [1] : vector<64x64xf32> to vector<64xf32>
    %77 = vector.shape_cast %76 : vector<64xf32> to vector<64x1xf32>
    %78 = arith.truncf %75 : vector<64x64xf32> to vector<64x64xbf16>
    %cst_24 = arith.constant dense<0.000000e+00> : vector<64x64xf32>
    %79 = tpu.matmul %78, %69, %cst_24 {dimension_numbers = #tpu.dot_dimension_numbers<[1], [0], [0], [1], [0, 0, 1, 1], [], []>} : vector<64x64xbf16>, vector<64x64xbf16>, vector<64x64xf32> -> vector<64x64xf32>
    %80 = tpu.reciprocal %77 {approx = true} : vector<64x1xf32> -> vector<64x1xf32>
    %81 = vector.broadcast %80 : vector<64x1xf32> to vector<64x64xf32>
    %82 = arith.mulf %79, %81 : vector<64x64xf32>
    %83 = arith.truncf %82 : vector<64x64xf32> to vector<64x64xbf16>
    %84 = vector.extract_strided_slice %5 {offsets = [0, 0], sizes = [64, 128], strides = [1, 1]} : vector<128x128xbf16> to vector<64x128xbf16>
    %cst_25 = arith.constant dense<0.000000e+00> : vector<64x128xf32>
    %85 = tpu.matmul %83, %84, %cst_25 {dimension_numbers = #tpu.dot_dimension_numbers<[1], [0], [0], [1], [0, 0, 1, 1], [], []>} : vector<64x64xbf16>, vector<64x128xbf16>, vector<64x128xf32> -> vector<64x128xf32>
    %86 = arith.addf %8, %85 : vector<64x128xf32>
    %87 = vector.extract_strided_slice %61 {offsets = [0, 64], sizes = [64, 64], strides = [1, 1]} : vector<64x128xf32> to vector<64x64xf32>
    %88 = arith.truncf %87 : vector<64x64xf32> to vector<64x64xbf16>
    %89 = vector.extract_strided_slice %62 {offsets = [0, 64], sizes = [64, 64], strides = [1, 1]} : vector<64x128xf32> to vector<64x64xf32>
    %90 = arith.truncf %89 : vector<64x64xf32> to vector<64x64xbf16>
    %91 = vector.extract_strided_slice %63 {offsets = [0, 64], sizes = [64, 64], strides = [1, 1]} : vector<64x128xf32> to vector<64x64xf32>
    %92 = arith.truncf %91 : vector<64x64xf32> to vector<64x64xbf16>
    %cst_26 = arith.constant dense<0.000000e+00> : vector<64x64xf32>
    %93 = tpu.matmul %88, %90, %cst_26 {dimension_numbers = #tpu.dot_dimension_numbers<[1], [1], [0], [0], [0, 0, 1, 0], [], []>} : vector<64x64xbf16>, vector<64x64xbf16>, vector<64x64xf32> -> vector<64x64xf32>
    %cst_27 = arith.constant dense<0xFF800000> : vector<64xf32>
    %94 = vector.multi_reduction <maximumf>, %93, %cst_27 [1] : vector<64x64xf32> to vector<64xf32>
    %95 = vector.shape_cast %94 : vector<64xf32> to vector<64x1xf32>
    %96 = vector.broadcast %95 : vector<64x1xf32> to vector<64x64xf32>
    %97 = arith.subf %93, %96 : vector<64x64xf32>
    %98 = math.exp %97 : vector<64x64xf32>
    %cst_28 = arith.constant dense<0.000000e+00> : vector<64xf32>
    %99 = vector.multi_reduction <add>, %98, %cst_28 [1] : vector<64x64xf32> to vector<64xf32>
    %100 = vector.shape_cast %99 : vector<64xf32> to vector<64x1xf32>
    %101 = arith.truncf %98 : vector<64x64xf32> to vector<64x64xbf16>
    %cst_29 = arith.constant dense<0.000000e+00> : vector<64x64xf32>
    %102 = tpu.matmul %101, %92, %cst_29 {dimension_numbers = #tpu.dot_dimension_numbers<[1], [0], [0], [1], [0, 0, 1, 1], [], []>} : vector<64x64xbf16>, vector<64x64xbf16>, vector<64x64xf32> -> vector<64x64xf32>
    %103 = tpu.reciprocal %100 {approx = true} : vector<64x1xf32> -> vector<64x1xf32>
    %104 = vector.broadcast %103 : vector<64x1xf32> to vector<64x64xf32>
    %105 = arith.mulf %102, %104 : vector<64x64xf32>
    %106 = arith.truncf %105 : vector<64x64xf32> to vector<64x64xbf16>
    %107 = vector.extract_strided_slice %5 {offsets = [64, 0], sizes = [64, 128], strides = [1, 1]} : vector<128x128xbf16> to vector<64x128xbf16>
    %cst_30 = arith.constant dense<0.000000e+00> : vector<64x128xf32>
    %108 = tpu.matmul %106, %107, %cst_30 {dimension_numbers = #tpu.dot_dimension_numbers<[1], [0], [0], [1], [0, 0, 1, 1], [], []>} : vector<64x64xbf16>, vector<64x128xbf16>, vector<64x128xf32> -> vector<64x128xf32>
    %109 = arith.addf %86, %108 : vector<64x128xf32>
    %c1 = arith.constant 1 : index
    %c0_31 = arith.constant 0 : index
    %c0_32 = arith.constant 0 : index
    %110 = vector.load %arg5[%c1, %c0_31, %c0_32] : memref<2x64x128xf32, #tpu.memory_space<vmem>>, vector<1x64x128xf32>
    %111 = vector.shape_cast %110 : vector<1x64x128xf32> to vector<64x128xf32>
    %112 = vector.shape_cast %109 : vector<64x128xf32> to vector<1x64x128xf32>
    tpu.vector_store %arg5[%c1, %c0_31, %c0_32], %112 {strides = array<i32>} : memref<2x64x128xf32, #tpu.memory_space<vmem>>, vector<1x64x128xf32>,
    return
  }
  func.func @transform_0(%arg0: i32) -> (i32, i32, i32) {
    %c0_i32 = arith.constant 0 : i32
    %c0_i32_0 = arith.constant 0 : i32
    %c0_i32_1 = arith.constant 0 : i32
    return %arg0, %c0_i32, %c0_i32_0 : i32, i32, i32
  }
  func.func @transform_1(%arg0: i32) -> (i32, i32) {
    %c0_i32 = arith.constant 0 : i32
    %c0_i32_0 = arith.constant 0 : i32
    %c0_i32_1 = arith.constant 0 : i32
    return %c0_i32, %c0_i32_0 : i32, i32
  }
  func.func @transform_2(%arg0: i32) -> (i32, i32) {
    %c0_i32 = arith.constant 0 : i32
    %c0_i32_0 = arith.constant 0 : i32
    %c0_i32_1 = arith.constant 0 : i32
    return %c0_i32, %c0_i32_0 : i32, i32
  }
  func.func @transform_3(%arg0: i32) -> (i32, i32) {
    %c0_i32 = arith.constant 0 : i32
    %c0_i32_0 = arith.constant 0 : i32
    %c0_i32_1 = arith.constant 0 : i32
    return %c0_i32, %c0_i32_0 : i32, i32
  }
  func.func @transform_4(%arg0: i32) -> (i32, i32, i32) {
    %c0_i32 = arith.constant 0 : i32
    %c0_i32_0 = arith.constant 0 : i32
    %c0_i32_1 = arith.constant 0 : i32
    return %arg0, %c0_i32, %c0_i32_0 : i32, i32, i32
  }
}

</mosaic_0001>

<bundles_post_ra>
// kernel: tpu_custom_call.1
= control target key start
LH: loop header
LB: loop body
LE: loop exit
PB: predicated region body
PF: predicated region fallthrough
CT: control target
= control target key end

     0   :  { %9 = vsyncpa [#allocation3], 0  ;;  %s2494_s0 = inlined_call_operand.hbm [shape: f32[2,64,128], index: 0, kind: input, shape index: {}]   ;;  %s2495_s1 = inlined_call_operand.hbm [shape: bf16[128,384], index: 1, kind: input, shape index: {}]   ;;  %s2496_s2 = inlined_call_operand.hbm [shape: bf16[128,128], index: 2, kind: input, shape index: {}]   ;;  %s2497_s3 = inlined_call_operand.vmem [shape: f32[1,128], index: 3, kind: input, shape index: {}]   ;;  %s2498_s4 = inlined_call_operand.hbm [shape: f32[2,64,128], index: 4, kind: output, shape index: {}]  }
   0x1   :  { %10 = vsyncpa [#allocation6], 0  ;;  %s29_s17 = sshll.u32 %s2495_s1, 4  ;;  %s30_s17 = int_to_ptr.hbm [resolvable:$true] %s29_s17 }
   0x2   :  { %11 = vsyncpa [#allocation4], 0  ;;  %s2028_s18 = smov [#allocation5]   ;;  %s16_s22 = sshll.u32 %s2494_s0, 4  ;;  %s17_s22 = int_to_ptr.hbm [resolvable:$true] %s16_s22 }
   0x3   :  { %s31_s19 = sshll.u32 %s2028_s18, 4  ;;  %s2029_s23 = smov 192   ;;  %s32_s19 = int_to_ptr.vmem [resolvable:$true] %s31_s19 }
   0x4   :  { %s2030_s24 = smov 12   ;;  %s2031_s25 = smov [#allocation2]  }
   0x5   :  { %37 = dma.hbm_to_vmem [thread:$0]  %s30_s17, 3072, %s32_s19, [#allocation6], %s2029_s23, %s2029_s23, %s2030_s24  }
   0x6   :  { %s18_s26 = sshll.u32 %s2031_s25, 4  ;;  %s2032_s27 = smov 128   ;;  %s19_s26 = int_to_ptr.vmem [resolvable:$true] %s18_s26 }
   0x7   :  { %s2033_s28 = smov 8   ;;  %s42_s30 = sshll.u32 %s2496_s2, 4  ;;  %s43_s30 = int_to_ptr.hbm [resolvable:$true] %s42_s30 }
   0x8   :  { %24 = dma.hbm_to_vmem [thread:$0]  %s17_s22, 2048, %s19_s26, [#allocation3], %s2032_s27, %s2032_s27, %s2033_s28  }
   0x9   :  { %s2034_s5 = smov [#allocation7]   ;;  %s2035_s6 = smov 64  }
   0xa   :  { %s44_s0 = sshll.u32 %s2034_s5, 4  ;;  %s2036_s7 = smov 4   ;;  %s45_s0 = int_to_ptr.vmem [resolvable:$true] %s44_s0 }
   0xb   :  { %50 = dma.hbm_to_vmem [thread:$0]  %s43_s30, 1024, %s45_s0, [#allocation6], %s2035_s6, %s2035_s6, %s2036_s7  }
   0xc   :  { %2022 = dma.done.wait [#allocation3], 2048  }
   0xd   :  { %2023 = vsyncadd [#allocation3], 4294965248 }
   0xe   :  { %2024 = dma.done.wait [#allocation6], 4096  }
   0xf   :  { %2025 = vsyncadd [#allocation6], 4294963200  ;;  %v1760_v0 = vld [vmem:[#allocation5 + $0xac] sm:$0xf]  ;;  %v1651_v1 = vld [vmem:[#allocation5 + $0xb4] sm:$0xf0] }
  0x10   :  { %v1757_v2 = vld [vmem:[#allocation5 + $0x94] sm:$0xf]  ;;  %v1654_v3 = vor.u32 %v1760_v0, %v1651_v1  ;;  %v1639_v4 = vld [vmem:[#allocation5 + $0x9c] sm:$0xf0]  ;;  %v1754_v6 = vld [vmem:[#allocation5 + $0x7c] sm:$0xf] }
  0x11   :  { %v1642_v5 = vor.u32 %v1757_v2, %v1639_v4  ;;  %v1627_v7 = vld [vmem:[#allocation5 + $0x84] sm:$0xf0]  ;;  %v1751_v9 = vld [vmem:[#allocation5 + $0x64] sm:$0xf]  ;;  %v1615_v10 = vld [vmem:[#allocation5 + $0x6c] sm:$0xf0] }
  0x12   :  { %299 = vmatpush.bf16.msra.mxu1 %v1654_v3  ;;  %1779 = vmatpush.bf16.msra.mxu3 %v1654_v3  ;;  %v1630_v8 = vor.u32 %v1754_v6, %v1627_v7  ;;  %v1618_v11 = vor.u32 %v1751_v9, %v1615_v10  ;;  %v1748_v12 = vld [vmem:[#allocation5 + $0x4c] sm:$0xf]  ;;  %v1603_v13 = vld [vmem:[#allocation5 + $0x54] sm:$0xf0]  ;;  %v1745_v15 = vld [vmem:[#allocation5 + $0x34] sm:$0xf] }
  0x13   :  { %v1606_v14 = vor.u32 %v1748_v12, %v1603_v13  ;;  %v1591_v16 = vld [vmem:[#allocation5 + $0x3c] sm:$0xf0]  ;;  %v1742_v18 = vld [vmem:[#allocation5 + $0x1c] sm:$0xf]  ;;  %v1579_v19 = vld [vmem:[#allocation5 + $0x24] sm:$0xf0] }
  0x14   :  { %v1594_v17 = vor.u32 %v1745_v15, %v1591_v16  ;;  %v1582_v20 = vor.u32 %v1742_v18, %v1579_v19  ;;  %v1739_v21 = vld [vmem:[#allocation5 + $0x4] sm:$0xf]  ;;  %v1567_v22 = vld [vmem:[#allocation5 + $0xc] sm:$0xf0]  ;;  %v67_v25 = vld [vmem:[#allocation2 + $0x8] sm:$0xff]  ;;  %vm429_vm0 = vcmask 523264  }
  0x15   :  { %v1570_v23 = vor.u32 %v1739_v21, %v1567_v22  ;;  %v66_v24 = vld [vmem:[#allocation2] sm:$0xff]  ;;  %v68_v27 = vld [vmem:[#allocation2 + $0x10] sm:$0xff]  ;;  %v69_v28 = vld [vmem:[#allocation2 + $0x18] sm:$0xff]  ;;  %s1549_s12 = sshll.u32 %s2498_s4, 4  ;;  %s1550_s12 = int_to_ptr.hbm [resolvable:$true] %s1549_s12 }
  0x16   :  { %300 = vmatpush.bf16.msra.mxu1 %v1642_v5  ;;  %1780 = vmatpush.bf16.msra.mxu3 %v1642_v5  ;;  %v2077_v26 = vpack.c.bf16 %v67_v25, %v66_v24  ;;  %v2080_v29 = vpack.c.bf16 %v69_v28, %v68_v27  ;;  %v1649_v30 = vld [vmem:[#allocation5 + $0xa8] sm:$0xf]  ;;  %v1761_v31 = vld [vmem:[#allocation5 + $0xb0] sm:$0xf0]  ;;  %v1637_v33 = vld [vmem:[#allocation5 + $0x90] sm:$0xf] }
  0x17   :  { %v1650_v32 = vor.u32 %v1761_v31, %v1649_v30  ;;  %v1758_v34 = vld [vmem:[#allocation5 + $0x98] sm:$0xf0]  ;;  %v1625_v36 = vld [vmem:[#allocation5 + $0x78] sm:$0xf]  ;;  %v1755_v37 = vld [vmem:[#allocation5 + $0x80] sm:$0xf0] }
  0x18   :  { %v1638_v35 = vor.u32 %v1758_v34, %v1637_v33  ;;  %v1626_v38 = vor.u32 %v1755_v37, %v1625_v36  ;;  %v1613_v39 = vld [vmem:[#allocation5 + $0x60] sm:$0xf]  ;;  %v1752_v40 = vld [vmem:[#allocation5 + $0x68] sm:$0xf0]  ;;  %v1601_v44 = vld [vmem:[#allocation5 + $0x48] sm:$0xf] }
  0x19   :  { %250 = vmatpush.bf16.msra.mxu0 %v1650_v32  ;;  %1771 = vmatpush.bf16.msra.mxu2 %v1650_v32  ;;  %v70_v41 = vld [vmem:[#allocation2 + $0x20] sm:$0xff]  ;;  %v71_v42 = vld [vmem:[#allocation2 + $0x28] sm:$0xff]  ;;  %v1614_v43 = vor.u32 %v1752_v40, %v1613_v39  ;;  %v1749_v45 = vld [vmem:[#allocation5 + $0x50] sm:$0xf0] }
  0x1a   :  { %301 = vmatpush.bf16.msra.mxu1 %v1630_v8  ;;  %1781 = vmatpush.bf16.msra.mxu3 %v1630_v8  ;;  %v2083_v46 = vpack.c.bf16 %v71_v42, %v70_v41  ;;  %v1602_v47 = vor.u32 %v1749_v45, %v1601_v44  ;;  %v1589_v48 = vld [vmem:[#allocation5 + $0x30] sm:$0xf]  ;;  %v1746_v49 = vld [vmem:[#allocation5 + $0x38] sm:$0xf0]  ;;  %v1577_v51 = vld [vmem:[#allocation5 + $0x18] sm:$0xf] }
  0x1b   :  { %v1590_v50 = vor.u32 %v1746_v49, %v1589_v48  ;;  %v1743_v52 = vld [vmem:[#allocation5 + $0x20] sm:$0xf0]  ;;  %v1565_v54 = vld [vmem:[#allocation5] sm:$0xf]  ;;  %v1740_v55 = vld [vmem:[#allocation5 + $0x8] sm:$0xf0] }
  0x1c   :  { %v1578_v53 = vor.u32 %v1743_v52, %v1577_v51  ;;  %v72_v56 = vld [vmem:[#allocation2 + $0x30] sm:$0xff]  ;;  %v73_v57 = vld [vmem:[#allocation2 + $0x38] sm:$0xff]  ;;  %v1566_v58 = vor.u32 %v1740_v55, %v1565_v54  ;;  %v78_v60 = vld [vmem:[#allocation2 + $0x60] sm:$0xff] }
  0x1d   :  { %251 = vmatpush.bf16.msra.mxu0 %v1638_v35  ;;  %1772 = vmatpush.bf16.msra.mxu2 %v1638_v35  ;;  %v2086_v59 = vpack.c.bf16 %v73_v57, %v72_v56  ;;  %v79_v61 = vld [vmem:[#allocation2 + $0x68] sm:$0xff]  ;;  %v1657_v63 = vld [vmem:[#allocation5 + $0xb0] sm:$0xf]  ;;  %v1762_v0 = vld [vmem:[#allocation5 + $0xb8] sm:$0xf0] }
  0x1e   :  { %302 = vmatpush.bf16.msra.mxu1 %v1618_v11  ;;  %1782 = vmatpush.bf16.msra.mxu3 %v1618_v11  ;;  %v2093_v62 = vpack.c.bf16 %v79_v61, %v78_v60  ;;  %v1658_v1 = vor.u32 %v1762_v0, %v1657_v63  ;;  %v1645_v2 = vld [vmem:[#allocation5 + $0x98] sm:$0xf]  ;;  %v1759_v3 = vld [vmem:[#allocation5 + $0xa0] sm:$0xf0]  ;;  %v1633_v5 = vld [vmem:[#allocation5 + $0x80] sm:$0xf] }
  0x1f   :  { %v1646_v4 = vor.u32 %v1759_v3, %v1645_v2  ;;  %v1756_v6 = vld [vmem:[#allocation5 + $0x88] sm:$0xf0]  ;;  %v1621_v8 = vld [vmem:[#allocation5 + $0x68] sm:$0xf]  ;;  %v1753_v9 = vld [vmem:[#allocation5 + $0x70] sm:$0xf0] }
  0x20   :  { %v1634_v7 = vor.u32 %v1756_v6, %v1633_v5  ;;  %v1622_v11 = vor.u32 %v1753_v9, %v1621_v8  ;;  %v80_v12 = vld [vmem:[#allocation2 + $0x70] sm:$0xff]  ;;  %v81_v13 = vld [vmem:[#allocation2 + $0x78] sm:$0xff]  ;;  %v1747_v19 = vld [vmem:[#allocation5 + $0x40] sm:$0xf0] }
  0x21   :  { %252 = vmatpush.bf16.msra.mxu0 %v1626_v38  ;;  %1773 = vmatpush.bf16.msra.mxu2 %v1626_v38  ;;  %v1609_v15 = vld [vmem:[#allocation5 + $0x50] sm:$0xf]  ;;  %v1750_v16 = vld [vmem:[#allocation5 + $0x58] sm:$0xf0]  ;;  %v1597_v18 = vld [vmem:[#allocation5 + $0x38] sm:$0xf] }
  0x22   :  { %303 = vmatpush.bf16.msra.mxu1 %v1606_v14  ;;  %1783 = vmatpush.bf16.msra.mxu3 %v1606_v14  ;;  %v2097_v14 = vpack.c.bf16 %v81_v13, %v80_v12  ;;  %v1598_v21 = vor.u32 %v1747_v19, %v1597_v18  ;;  %v1585_v22 = vld [vmem:[#allocation5 + $0x20] sm:$0xf]  ;;  %v1573_v25 = vld [vmem:[#allocation5 + $0x8] sm:$0xf]  ;;  %v1741_v27 = vld [vmem:[#allocation5 + $0x10] sm:$0xf0] }
  0x23   :  { %v1574_v30 = vor.u32 %v1741_v27, %v1573_v25  ;;  %v74_v54 = vld [vmem:[#allocation2 + $0x40] sm:$0xff]  ;;  %v75_v55 = vld [vmem:[#allocation2 + $0x48] sm:$0xff] }
  0x24   :  { %v86_v56 = vpack.c.bf16 %v75_v55, %v74_v54 }
  0x25   :  { %253 = vmatpush.bf16.msra.mxu0 %v1614_v43  ;;  %1774 = vmatpush.bf16.msra.mxu2 %v1614_v43 }
  0x26   :  { %304 = vmatpush.bf16.msra.mxu1 %v1594_v17  ;;  %1784 = vmatpush.bf16.msra.mxu3 %v1594_v17  ;;  %v1610_v17 = vor.u32 %v1750_v16, %v1609_v15 }
  0x29   :  { %254 = vmatpush.bf16.msra.mxu0 %v1602_v47  ;;  %1775 = vmatpush.bf16.msra.mxu2 %v1602_v47 }
  0x2a   :  { %305 = vmatpush.bf16.msra.mxu1 %v1582_v20  ;;  %1785 = vmatpush.bf16.msra.mxu3 %v1582_v20 }
  0x2d   :  { %255 = vmatpush.bf16.msra.mxu0 %v1590_v50  ;;  %1776 = vmatpush.bf16.msra.mxu2 %v1590_v50 }
  0x2e   :  { %306 = vmatpush.bf16.msra.mxu1 %v1570_v23  ;;  %1786 = vmatpush.bf16.msra.mxu3 %v1570_v23  ;;  %v1744_v23 = vld [vmem:[#allocation5 + $0x28] sm:$0xf0] }
  0x2f   :  { %v1586_v24 = vor.u32 %v1744_v23, %v1585_v22 }
  0x31   :  { %307 = vmatmul.bf16.vlgmr.msra.gmra.mxu1 %v2077_v26  ;;  %256 = vmatpush.bf16.msra.mxu0 %v1578_v53 }
  0x32   :  { %1777 = vmatpush.bf16.msra.mxu2 %v1578_v53  ;;  %337 = vmatmul.bf16.vlgmr.msra.gmra.mxu3 %v2093_v62 }
  0x35   :  { %257 = vmatpush.bf16.msra.mxu0 %v1566_v58 }
  0x36   :  { %1778 = vmatpush.bf16.msra.mxu2 %v1566_v58  ;;  %v76_v58 = vld [vmem:[#allocation2 + $0x50] sm:$0xff] }
  0x38   :  { %258 = vmatmul.bf16.vlgmr.msra.gmra.mxu0 %v2077_v26 }
  0x39   :  { %288 = vmatmul.bf16.vlgmr.msra.gmra.mxu2 %v2093_v62 }
  0x3a   :  { %348 = vmatpush.bf16.msrb.mxu2 %v1658_v1 }
  0x3e   :  { %349 = vmatpush.bf16.msrb.mxu2 %v1646_v4 }
  0x41   :  { %312 = vmatmul.bf16.gmra.mxu1 %v2080_v29 }
  0x42   :  { %350 = vmatpush.bf16.msrb.mxu2 %v1634_v7  ;;  %342 = vmatmul.bf16.gmra.mxu3 %v2097_v14 }
  0x46   :  { %351 = vmatpush.bf16.msrb.mxu2 %v1622_v11 }
  0x48   :  { %263 = vmatmul.bf16.gmra.mxu0 %v2080_v29 }
  0x49   :  { %293 = vmatmul.bf16.gmra.mxu2 %v2097_v14 }
  0x4a   :  { %352 = vmatpush.bf16.msrb.mxu2 %v1610_v17 }
  0x4e   :  { %353 = vmatpush.bf16.msrb.mxu2 %v1598_v21 }
  0x51   :  { %317 = vmatmul.bf16.gmra.mxu1 %v2083_v46 }
  0x52   :  { %354 = vmatpush.bf16.msrb.mxu2 %v1586_v24 }
  0x56   :  { %355 = vmatpush.bf16.msrb.mxu2 %v1574_v30 }
  0x58   :  { %268 = vmatmul.bf16.gmra.mxu0 %v2083_v46 }
  0x59   :  { %356 = vmatmul.bf16.vlgmr.msrb.gmra.mxu2 %v2077_v26 }
  0x61   :  { %322 = vmatmul.bf16.gmra.mxu1 %v2086_v59 }
  0x68   :  { %273 = vmatmul.bf16.gmra.mxu0 %v2086_v59 }
  0x69   :  { %361 = vmatmul.bf16.gmra.mxu2 %v2080_v29 }
  0x71   :  { %327 = vmatmul.bf16.gmra.mxu1 %v86_v56 }
  0x78   :  { %278 = vmatmul.bf16.gmra.mxu0 %v86_v56 }
  0x79   :  { %366 = vmatmul.bf16.gmra.mxu2 %v2083_v46 }
  0x89   :  { %371 = vmatmul.bf16.gmra.mxu2 %v2086_v59  ;;  %v77_v59 = vld [vmem:[#allocation2 + $0x58] sm:$0xff] }
  0x8a   :  { %v87_v60 = vpack.c.bf16 %v77_v59, %v76_v58 }
  0x8c   :  { %332 = vmatmul.bf16.gmra.mxu1 %v87_v60  ;;  %283 = vmatmul.bf16.gmra.mxu0 %v87_v60 }
  0x99   :  { %376 = vmatmul.bf16.gmra.mxu2 %v86_v56 }
  0xa9   :  { %381 = vmatmul.bf16.gmra.mxu2 %v87_v60 }
  0xae   :  { %v308_v10 = vpop.f32.mrf.mxu1 }
  0xb5   :  { %v259_v37 = vpop.f32.mrf.mxu0  ;;  %v338_v9 = vpop.f32.mrf.mxu3 }
  0xb6   :  { %v310_v20 = vpop.f32.mrf.mxu1 }
  0xb7   :  { %v421_v34 = vpack.c.bf16 %v310_v20, %v308_v10 }
  0xb9   :  { %v443_v48 = vsel %vm429_vm0, %v421_v34, 0  ;;  %386 = vmatmul.bf16.gmra.mxu2 %v2093_v62 }
  0xbc   :  { %v2119_v57 = vpop.f32.mrf.mxu2 }
  0xbd   :  { %v261_v39 = vpop.f32.mrf.mxu0  ;;  %v340_v12 = vpop.f32.mrf.mxu3 }
  0xbe   :  { %v313_v28 = vpop.f32.mrf.mxu1  ;;  %v417_v41 = vpack.c.bf16 %v261_v39, %v259_v37  ;;  %v2158_v39 = vld [vmem:[#allocation7] sm:$0xff] }
  0xc0   :  { %697 = vrot.lane.b32.xlu2 %v417_v41, %s2035_s6 }
  0xc4   :  { %v2122_v61 = vpop.f32.mrf.mxu2 }
  0xc5   :  { %v264_v43 = vpop.f32.mrf.mxu0  ;;  %v343_v17 = vpop.f32.mrf.mxu3 }
  0xc6   :  { %v315_v31 = vpop.f32.mrf.mxu1 }
  0xc7   :  { %v422_v32 = vpack.c.bf16 %v315_v31, %v313_v28 }
  0xc9   :  { %711 = vrot.lane.b32.xlu1 %v422_v32, %s2035_s6  ;;  %v446_v46 = vsel %vm429_vm0, %v422_v32, 0  ;;  %391 = vmatmul.bf16.gmra.mxu2 %v2097_v14  ;;  %v2146_v32 = vld [vmem:[#allocation7 + $0x18] sm:$0xff] }
  0xca   :  { %660 = vmatpush.bf16.msrb.mxu0 %v2146_v32 }
  0xcc   :  { %v2124_v63 = vpop.f32.mrf.mxu2 }
  0xcd   :  { %v266_v44 = vpop.f32.mrf.mxu0  ;;  %v345_v21 = vpop.f32.mrf.mxu3 }
  0xce   :  { %v318_v33 = vpop.f32.mrf.mxu1  ;;  %v418_v45 = vpack.c.bf16 %v266_v44, %v264_v43  ;;  %v2155_v37 = vpack.c.bf16 %v345_v21, %v343_v17 }
  0xd0   :  { %699 = vrot.lane.b32.xlu2 %v418_v45, %s2035_s6 }
  0xd1   :  { %709 = vrot.lane.b32.xlu1 %v421_v34, %s2035_s6 }
  0xd4   :  { %v2128_v0 = vpop.f32.mrf.mxu2 }
  0xd5   :  { %v269_v47 = vpop.f32.mrf.mxu0 }
  0xd6   :  { %v320_v35 = vpop.f32.mrf.mxu1 }
  0xd7   :  { %v423_v42 = vpack.c.bf16 %v320_v35, %v318_v33  ;;  %v2149_v35 = vld [vmem:[#allocation7 + $0x10] sm:$0xff] }
  0xd8   :  { %661 = vmatpush.bf16.msrb.mxu0 %v2149_v35 }
  0xd9   :  { %v449_v29 = vsel %vm429_vm0, %v423_v42, 0 }
  0xdc   :  { %v357_v1 = vpop.f32.mrf.mxu2 }
  0xdd   :  { %v271_v49 = vpop.f32.mrf.mxu0 }
  0xde   :  { %v323_v36 = vpop.f32.mrf.mxu1  ;;  %v419_v50 = vpack.c.bf16 %v271_v49, %v269_v47 }
  0xe4   :  { %v359_v2 = vpop.f32.mrf.mxu2 }
  0xe5   :  { %v274_v51 = vpop.f32.mrf.mxu0  ;;  %v2140_v25 = vpack.c.bf16 %v359_v2, %v357_v1 }
  0xe6   :  { %v325_v38 = vpop.f32.mrf.mxu1 }
  0xe7   :  { %v424_v40 = vpack.c.bf16 %v325_v38, %v323_v36  ;;  %v2153_v36 = vld [vmem:[#allocation7 + $0x8] sm:$0xff] }
  0xe8   :  { %662 = vmatpush.bf16.msrb.mxu0 %v2153_v36 }
  0xe9   :  { %715 = vrot.lane.b32.xlu0 %v424_v40, %s2035_s6  ;;  %v452_v26 = vsel %vm429_vm0, %v424_v40, 0  ;;  %v1038_v40 = vsel %vm429_vm0, %v2155_v37, 0 }
  0xea   :  { %458 = vmatpush.bf16.xpose.msrb.mxu3 %v452_v26 }
  0xec   :  { %v362_v3 = vpop.f32.mrf.mxu2  ;;  %663 = vmatpush.bf16.msrb.mxu0 %v2158_v39 }
  0xed   :  { %v276_v52 = vpop.f32.mrf.mxu0 }
  0xee   :  { %v420_v53 = vpack.c.bf16 %v276_v52, %v274_v51  ;;  %v328_v34 = vpop.f32.mrf.mxu1 }
  0xf0   :  { %703 = vrot.lane.b32.xlu1 %v420_v53, %s2035_s6  ;;  %1044 = vmatpush.bf16.xpose.msra.mxu0 %v1038_v40 }
  0xf1   :  { %713 = vrot.lane.b32.xlu0 %v423_v42, %s2035_s6 }
  0xf2   :  { %459 = vmatpush.bf16.xpose.msrb.mxu3 %v449_v29 }
  0xf4   :  { %v364_v6 = vpop.f32.mrf.mxu2 }
  0xf5   :  { %v426_v23 = vpack.c.bf16 %v364_v6, %v362_v3 }
  0xf6   :  { %v330_v38 = vpop.f32.mrf.mxu1 }
  0xf9   :  { %701 = vrot.lane.b32.xlu0 %v419_v50, %s2035_s6 }
  0xfa   :  { %460 = vmatpush.bf16.xpose.msrb.mxu3 %v446_v46  ;;  %v2173_v46 = vpack.c.bf16 %v330_v38, %v328_v34 }
  0xfc   :  { %v367_v10 = vpop.f32.mrf.mxu2  ;;  %v1029_v47 = vsel %vm429_vm0, %v2173_v46, 0 }
 0x102   :  { %461 = vmatpush.bf16.xpose.msrb.mxu3 %v443_v48 }
 0x104   :  { %v369_v13 = vpop.f32.mrf.mxu2 }
 0x105   :  { %v2137_v22 = vpack.c.bf16 %v369_v13, %v367_v10 }
 0x109   :  { %1659 = vmatmul.msk.bf16.vlgmr.msrb.gmra.mxu3 %vm429_vm0, %v417_v41  ;;  %v2163_v41 = vpack.c.bf16 %v340_v12, %v338_v9  ;;  %v333_v42 = vpop.f32.mrf.mxu1 }
 0x10b   :  { %v1035_v43 = vsel %vm429_vm0, %v2163_v41, 0 }
 0x10c   :  { %v372_v16 = vpop.f32.mrf.mxu2  ;;  %1045 = vmatpush.bf16.xpose.msra.mxu0 %v1035_v43 }
 0x111   :  { %v335_v29 = vpop.f32.mrf.mxu1 }
 0x112   :  { %v2169_v44 = vpack.c.bf16 %v335_v29, %v333_v42 }
 0x114   :  { %v374_v19 = vpop.f32.mrf.mxu2 }
 0x115   :  { %v428_v20 = vpack.c.bf16 %v374_v19, %v372_v16 }
 0x117   :  { %575 = vmatpush.bf16.msra.mxu3 %v428_v20  ;;  %856 = vrot.lane.b32.xlu1 %v428_v20, %s2035_s6 }
 0x119   :  { %1660 = vmatmul.msk.bf16.gmra.mxu3 %vm429_vm0, %v418_v45  ;;  %v1032_v45 = vsel %vm429_vm0, %v2169_v44, 0 }
 0x11a   :  { %v698_v18 = vpop.permute.xlu2 %697  ;;  %1046 = vmatpush.bf16.xpose.msra.mxu0 %v1032_v45 }
 0x11b   :  { %576 = vmatpush.bf16.msra.mxu3 %v2137_v22 }
 0x11f   :  { %577 = vmatpush.bf16.msra.mxu3 %v426_v23 }
 0x122   :  { %1047 = vmatpush.bf16.xpose.msra.mxu0 %v1029_v47 }
 0x123   :  { %578 = vmatpush.bf16.msra.mxu3 %v2140_v25 }
 0x129   :  { %1661 = vmatmul.msk.bf16.gmra.mxu3 %vm429_vm0, %v419_v50 }
 0x12a   :  { %v700_v24 = vpop.permute.xlu2 %699 }
 0x139   :  { %1662 = vmatmul.msk.bf16.gmra.mxu3 %vm429_vm0, %v420_v53 }
 0x13b   :  { %v712_v11 = vpop.permute.xlu1 %711 }
 0x13c   :  { %v733_v62 = vsel %vm429_vm0, %v712_v11, 0 }
 0x143   :  { %v710_v14 = vpop.permute.xlu1 %709 }
 0x144   :  { %v730_v15 = vsel %vm429_vm0, %v710_v14, 0 }
 0x15b   :  { %v716_v4 = vpop.permute.xlu0 %715 }
 0x15c   :  { %v739_v5 = vsel %vm429_vm0, %v716_v4, 0 }
 0x15d   :  { %745 = vmatpush.bf16.xpose.msrb.mxu1 %v739_v5 }
 0x162   :  { %v704_v26 = vpop.permute.xlu1 %703 }
 0x163   :  { %v714_v7 = vpop.permute.xlu0 %713 }
 0x164   :  { %v736_v8 = vsel %vm429_vm0, %v714_v7, 0 }
 0x165   :  { %746 = vmatpush.bf16.xpose.msrb.mxu1 %v736_v8 }
 0x16b   :  { %v702_v33 = vpop.permute.xlu0 %701 }
 0x16d   :  { %747 = vmatpush.bf16.xpose.msrb.mxu1 %v733_v62 }
 0x175   :  { %748 = vmatpush.bf16.xpose.msrb.mxu1 %v730_v15 }
 0x17c   :  { %1687 = vmatmul.msk.bf16.vlgmr.msrb.gmra.mxu1 %vm429_vm0, %v698_v18 }
 0x189   :  { %v857_v15 = vpop.permute.xlu1 %856 }
 0x18a   :  { %878 = vmatpush.bf16.msra.mxu2 %v857_v15 }
 0x18c   :  { %v463_v27 = vpop.f32.mrf.mxu3  ;;  %1688 = vmatmul.msk.bf16.gmra.mxu1 %vm429_vm0, %v700_v24 }
 0x18d   :  { %v483_v28 = vsel %vm429_vm0, %v463_v27, -inf }
 0x18e   :  { %484 = vmax.xlane.f32.xlu2 %v483_v28 }
 0x194   :  { %v465_v30 = vpop.f32.mrf.mxu3 }
 0x195   :  { %v486_v31 = vsel %vm429_vm0, %v465_v30, -inf }
 0x196   :  { %487 = vmax.xlane.f32.xlu0 %v486_v31 }
 0x19c   :  { %1689 = vmatmul.msk.bf16.gmra.mxu1 %vm429_vm0, %v702_v33  ;;  %v468_v48 = vpop.f32.mrf.mxu3 }
 0x19d   :  { %v489_v49 = vsel %vm429_vm0, %v468_v48, -inf }
 0x1a4   :  { %v2186_v55 = vpop.f32.mrf.mxu3 }
 0x1a5   :  { %v492_v20 = vsel %vm429_vm0, %v2186_v55, -inf }
 0x1aa   :  { %852 = vrot.lane.b32.xlu0 %v426_v23, %s2035_s6 }
 0x1ac   :  { %1690 = vmatmul.msk.bf16.gmra.mxu1 %vm429_vm0, %v704_v26  ;;  %v2190_v3 = vpop.f32.mrf.mxu3 }
 0x1ad   :  { %v495_v23 = vsel %vm429_vm0, %v2190_v3, -inf }
 0x1b4   :  { %v2198_v9 = vpop.f32.mrf.mxu3 }
 0x1b5   :  { %v498_v11 = vsel %vm429_vm0, %v2198_v9, -inf }
 0x1bc   :  { %v2207_v62 = vpop.f32.mrf.mxu3 }
 0x1bd   :  { %v501_v13 = vsel %vm429_vm0, %v2207_v62, -inf }
 0x1c4   :  { %v2232_v31 = vpop.f32.mrf.mxu3 }
 0x1c5   :  { %v504_v34 = vsel %vm429_vm0, %v2232_v31, -inf }
 0x1d4   :  { %490 = vmax.xlane.f32.xlu0 %v489_v49 }
 0x1f9   :  { %v2178_v50 = vpop.f32.mrf.mxu1 }
 0x1fa   :  { %v770_v51 = vsel %vm429_vm0, %v2178_v50, -inf }
 0x1fb   :  { %771 = vmax.xlane.f32.xlu1 %v770_v51 }
 0x201   :  { %v2182_v52 = vpop.f32.mrf.mxu1  ;;  %v485_v53 = vpop.xlane.xlu2 %484 }
 0x202   :  { %v773_v54 = vsel %vm429_vm0, %v2182_v52, -inf  ;;  %v507_v56 = vsub.f32 %v463_v27, %v485_v53 }
 0x203   :  { %774 = vmax.xlane.f32.xlu2 %v773_v54 }
 0x204   :  { %v515_v58 = vmul.f32 1.442695, %v507_v56 }
 0x206   :  { %1798 = vpow2.f32 %v515_v58 }
 0x209   :  { %v2188_v59 = vpop.f32.mrf.mxu1  ;;  %v488_v60 = vpop.xlane.xlu0 %487 }
 0x20a   :  { %v508_v1 = vsub.f32 %v465_v30, %v488_v60  ;;  %v776_v18 = vsel %vm429_vm0, %v2188_v59, -inf }
 0x20c   :  { %v517_v2 = vmul.f32 1.442695, %v508_v1  ;;  %v1799_v6 = vpop.eup %1798 }
 0x20d   :  { %v531_v40 = vsel %vm429_vm0, %v1799_v6, 0.0 }
 0x20e   :  { %1800 = vpow2.f32 %v517_v2 }
 0x211   :  { %v2192_v4 = vpop.f32.mrf.mxu1 }
 0x212   :  { %v779_v5 = vsel %vm429_vm0, %v2192_v4, -inf }
 0x213   :  { %780 = vmax.xlane.f32.xlu0 %v779_v5 }
 0x214   :  { %v1801_v7 = vpop.eup %1800  ;;  %850 = vrot.lane.b32.xlu1 %v2140_v25, %s2035_s6 }
 0x215   :  { %v555_v8 = vpack.c.bf16 %v1801_v7, %v1799_v6  ;;  %v534_v30 = vsel %vm429_vm0, %v1801_v7, 0.0 }
 0x217   :  { %1663 = vmatmul.msk.bf16.vlgmr.msra.gmra.mxu3 %vm429_vm0, %v555_v8  ;;  %v2263_v8 = vpop.f32.mrf.mxu2 }
 0x219   :  { %v2201_v10 = vpop.f32.mrf.mxu1 }
 0x21a   :  { %v782_v28 = vsel %vm429_vm0, %v2201_v10, -inf }
 0x21b   :  { %854 = vrot.lane.b32.xlu2 %v2137_v22, %s2035_s6  ;;  %499 = vmax.xlane.f32.xlu0 %v498_v11 }
 0x21c   :  { %v853_v19 = vpop.permute.xlu0 %852 }
 0x21f   :  { %v2266_v11 = vpop.f32.mrf.mxu2 }
 0x221   :  { %v2209_v12 = vpop.f32.mrf.mxu1 }
 0x222   :  { %v785_v21 = vsel %vm429_vm0, %v2209_v12, -inf }
 0x223   :  { %502 = vmax.xlane.f32.xlu0 %v501_v13 }
 0x227   :  { %v2269_v15 = vpop.f32.mrf.mxu2 }
 0x229   :  { %v2213_v14 = vpop.f32.mrf.mxu1 }
 0x22a   :  { %v788_v24 = vsel %vm429_vm0, %v2213_v14, -inf }
 0x231   :  { %v2215_v16 = vpop.f32.mrf.mxu1 }
 0x232   :  { %v791_v17 = vsel %vm429_vm0, %v2215_v16, -inf }
 0x233   :  { %792 = vmax.xlane.f32.xlu0 %v791_v17 }
 0x23e   :  { %777 = vmax.xlane.f32.xlu1 %v776_v18 }
 0x244   :  { %493 = vmax.xlane.f32.xlu2 %v492_v20 }
 0x246   :  { %786 = vmax.xlane.f32.xlu1 %v785_v21  ;;  %v2272_v21 = vpop.f32.mrf.mxu2 }
 0x247   :  { %v491_v22 = vpop.xlane.xlu0 %490 }
 0x248   :  { %v509_v25 = vsub.f32 %v468_v48, %v491_v22 }
 0x24a   :  { %v519_v27 = vmul.f32 1.442695, %v509_v25 }
 0x24c   :  { %496 = vmax.xlane.f32.xlu2 %v495_v23  ;;  %1802 = vpow2.f32 %v519_v27 }
 0x24e   :  { %789 = vmax.xlane.f32.xlu1 %v788_v24 }
 0x252   :  { %v2234_v33 = vpop.eup %1802 }
 0x253   :  { %v537_v38 = vsel %vm429_vm0, %v2234_v33, 0.0 }
 0x254   :  { %783 = vmax.xlane.f32.xlu2 %v782_v28 }
 0x256   :  { %535 = vadd.xlane.f32.xlu1 %v534_v30 }
 0x25c   :  { %505 = vmax.xlane.f32.xlu2 %v504_v34  ;;  %v387_v34 = vpop.f32.mrf.mxu2 }
 0x25e   :  { %538 = vadd.xlane.f32.xlu1 %v537_v38 }
 0x264   :  { %532 = vadd.xlane.f32.xlu2 %v531_v40 }
 0x26e   :  { %v772_v26 = vpop.xlane.xlu1 %771 }
 0x26f   :  { %v794_v29 = vsub.f32 %v2178_v50, %v772_v26 }
 0x271   :  { %v802_v47 = vmul.f32 1.442695, %v794_v29 }
 0x276   :  { %v775_v42 = vpop.xlane.xlu2 %774 }
 0x277   :  { %v795_v43 = vsub.f32 %v2182_v52, %v775_v42 }
 0x279   :  { %v804_v45 = vmul.f32 1.442695, %v795_v43 }
 0x27b   :  { %1804 = vpow2.f32 %v804_v45 }
 0x27c   :  { %1806 = vpow2.f32 %v802_v47 }
 0x27e   :  { %v855_v48 = vpop.permute.xlu2 %854 }
 0x27f   :  { %879 = vmatpush.bf16.msra.mxu2 %v855_v48  ;;  %v389_v48 = vpop.f32.mrf.mxu2 }
 0x281   :  { %v1805_v49 = vpop.eup %1804 }
 0x282   :  { %v2243_v54 = vpop.eup %1806 }
 0x283   :  { %880 = vmatpush.bf16.msra.mxu2 %v853_v19  ;;  %v842_v56 = vpack.c.bf16 %v1805_v49, %v2243_v54 }
 0x286   :  { %v781_v51 = vpop.xlane.xlu0 %780  ;;  %v851_v53 = vpop.permute.xlu1 %850 }
 0x287   :  { %881 = vmatpush.bf16.msra.mxu2 %v851_v53 }
 0x28a   :  { %1691 = vmatmul.msk.bf16.vlgmr.msra.gmra.mxu2 %vm429_vm0, %v842_v56 }
 0x28b   :  { %1222 = vmatpush.bf16.msrb.mxu2 %v2146_v32  ;;  %v797_v32 = vsub.f32 %v2192_v4, %v781_v51 }
 0x28d   :  { %v808_v6 = vmul.f32 1.442695, %v797_v32 }
 0x28e   :  { %v500_v50 = vpop.xlane.xlu0 %499 }
 0x28f   :  { %1223 = vmatpush.bf16.msrb.mxu2 %v2149_v35  ;;  %v512_v52 = vsub.f32 %v2198_v9, %v500_v50 }
 0x291   :  { %v525_v58 = vmul.f32 1.442695, %v512_v52 }
 0x293   :  { %1224 = vmatpush.bf16.msrb.mxu2 %v2153_v36  ;;  %1808 = vpow2.f32 %v525_v58 }
 0x296   :  { %v503_v60 = vpop.xlane.xlu0 %502 }
 0x297   :  { %1225 = vmatpush.bf16.msrb.mxu2 %v2158_v39  ;;  %v513_v1 = vsub.f32 %v2207_v62, %v503_v60  ;;  %v821_v39 = vsel %vm429_vm0, %v1805_v49, 0.0 }
 0x299   :  { %v2253_v2 = vpop.eup %1808  ;;  %v527_v5 = vmul.f32 1.442695, %v513_v1 }
 0x29a   :  { %v546_v35 = vsel %vm429_vm0, %v2253_v2, 0.0 }
 0x29b   :  { %1810 = vpow2.f32 %v527_v5  ;;  %547 = vadd.xlane.f32.xlu2 %v546_v35  ;;  %v580_v5 = vpop.f32.mrf.mxu3 }
 0x29c   :  { %1812 = vpow2.f32 %v808_v6 }
 0x2a1   :  { %v2258_v7 = vpop.eup %1810 }
 0x2a2   :  { %v549_v36 = vsel %vm429_vm0, %v2258_v7, 0.0  ;;  %v1813_v4 = vpop.eup %1812 }
 0x2a3   :  { %550 = vadd.xlane.f32.xlu1 %v549_v36  ;;  %822 = vadd.xlane.f32.xlu2 %v821_v39  ;;  %v827_v9 = vsel %vm429_vm0, %v1813_v4, 0.0 }
 0x2a6   :  { %v793_v56 = vpop.xlane.xlu0 %792 }
 0x2a7   :  { %v801_v35 = vsub.f32 %v2215_v16, %v793_v56 }
 0x2a9   :  { %v816_v6 = vmul.f32 1.442695, %v801_v35 }
 0x2ab   :  { %828 = vadd.xlane.f32.xlu1 %v827_v9 }
 0x2b1   :  { %v778_v62 = vpop.xlane.xlu1 %777 }
 0x2b2   :  { %v796_v13 = vsub.f32 %v2188_v59, %v778_v62  ;;  %v1014_v62 = vpack.c.bf16 %v389_v48, %v387_v34 }
 0x2b4   :  { %v806_v17 = vmul.f32 1.442695, %v796_v13 }
 0x2b6   :  { %1814 = vpow2.f32 %v806_v17  ;;  %v582_v17 = vpop.f32.mrf.mxu3 }
 0x2b7   :  { %v494_v18 = vpop.xlane.xlu2 %493 }
 0x2b8   :  { %v510_v19 = vsub.f32 %v2186_v55, %v494_v18 }
 0x2b9   :  { %v787_v23 = vpop.xlane.xlu1 %786 }
 0x2ba   :  { %v521_v20 = vmul.f32 1.442695, %v510_v19  ;;  %v799_v55 = vsub.f32 %v2209_v12, %v787_v23 }
 0x2bc   :  { %v1815_v22 = vpop.eup %1814  ;;  %1816 = vpow2.f32 %v521_v20  ;;  %v812_v26 = vmul.f32 1.442695, %v799_v55 }
 0x2bd   :  { %v824_v24 = vsel %vm429_vm0, %v1815_v22, 0.0  ;;  %v843_v25 = vpack.c.bf16 %v1813_v4, %v1815_v22  ;;  %v2300_v22 = vpack.c.bf16 %v2272_v21, %v2269_v15  ;;  %v1770_v21 = vld [vmem:[#allocation7 + $0x38] sm:$0xff] }
 0x2be   :  { %825 = vadd.xlane.f32.xlu2 %v824_v24  ;;  %963 = vmatpush.bf16.msrb.mxu3 %v1770_v21 }
 0x2bf   :  { %v497_v27 = vpop.xlane.xlu2 %496  ;;  %1692 = vmatmul.msk.bf16.gmra.mxu2 %vm429_vm0, %v843_v25 }
 0x2c0   :  { %v511_v59 = vsub.f32 %v2190_v3, %v497_v27  ;;  %v1767_v27 = vld [vmem:[#allocation7 + $0x20] sm:$0xff] }
 0x2c1   :  { %v790_v42 = vpop.xlane.xlu1 %789 }
 0x2c2   :  { %v1817_v28 = vpop.eup %1816  ;;  %v523_v30 = vmul.f32 1.442695, %v511_v59  ;;  %v800_v3 = vsub.f32 %v2213_v14, %v790_v42  ;;  %v818_v14 = vsel %vm429_vm0, %v2243_v54, 0.0 }
 0x2c3   :  { %v540_v38 = vsel %vm429_vm0, %v1817_v28, 0.0  ;;  %v556_v40 = vpack.c.bf16 %v1817_v28, %v2234_v33 }
 0x2c4   :  { %1818 = vpow2.f32 %v523_v30  ;;  %541 = vadd.xlane.f32.xlu0 %v540_v38  ;;  %v814_v33 = vmul.f32 1.442695, %v800_v3 }
 0x2c5   :  { %1664 = vmatmul.msk.bf16.gmra.mxu3 %vm429_vm0, %v556_v40  ;;  %1820 = vpow2.f32 %v812_v26 }
 0x2c7   :  { %v784_v43 = vpop.xlane.xlu2 %783 }
 0x2c8   :  { %v798_v29 = vsub.f32 %v2201_v10, %v784_v43  ;;  %v392_v10 = vpop.f32.mrf.mxu2 }
 0x2c9   :  { %v536_v58 = vpop.xlane.xlu1 %535 }
 0x2ca   :  { %v1819_v45 = vpop.eup %1818  ;;  %v810_v47 = vmul.f32 1.442695, %v798_v29 }
 0x2cb   :  { %v543_v12 = vsel %vm429_vm0, %v1819_v45, 0.0  ;;  %v1821_v53 = vpop.eup %1820  ;;  %v557_v1 = vpack.c.bf16 %v2253_v2, %v1819_v45 }
 0x2cc   :  { %1822 = vpow2.f32 %v810_v47  ;;  %544 = vadd.xlane.f32.xlu0 %v543_v12  ;;  %v833_v23 = vsel %vm429_vm0, %v1821_v53, 0.0 }
 0x2cd   :  { %1824 = vpow2.f32 %v814_v33 }
 0x2cf   :  { %v506_v49 = vpop.xlane.xlu2 %505 }
 0x2d0   :  { %v514_v51 = vsub.f32 %v2232_v31, %v506_v49  ;;  %v394_v36 = vpop.f32.mrf.mxu2 }
 0x2d1   :  { %v1015_v4 = vpack.c.bf16 %v394_v36, %v392_v10  ;;  %v539_v42 = vpop.xlane.xlu1 %538 }
 0x2d2   :  { %v1823_v50 = vpop.eup %1822  ;;  %v529_v52 = vmul.f32 1.442695, %v514_v51 }
 0x2d3   :  { %v830_v60 = vsel %vm429_vm0, %v1823_v50, 0.0  ;;  %v844_v32 = vpack.c.bf16 %v1821_v53, %v1823_v50  ;;  %v1825_v54 = vpop.eup %1824  ;;  %1161 = vmatpush.bf16.msra.mxu1 %v1015_v4 }
 0x2d4   :  { %1826 = vpow2.f32 %v529_v52  ;;  %819 = vadd.xlane.f32.xlu0 %v818_v14  ;;  %831 = vadd.xlane.f32.xlu1 %v830_v60  ;;  %v836_v39 = vsel %vm429_vm0, %v1825_v54, 0.0 }
 0x2d5   :  { %1665 = vmatmul.msk.bf16.gmra.mxu3 %vm429_vm0, %v557_v1  ;;  %1693 = vmatmul.msk.bf16.gmra.mxu2 %vm429_vm0, %v844_v32  ;;  %1828 = vrcp.f32 %v536_v58 }
 0x2d6   :  { %1277 = vrot.lane.b32.xlu2 %v2155_v37, %s2035_s6 }
 0x2d7   :  { %v533_v31 = vpop.xlane.xlu2 %532  ;;  %1162 = vmatpush.bf16.msra.mxu1 %v1014_v62 }
 0x2d8   :  { %1830 = vrcp.f32 %v533_v31 }
 0x2d9   :  { %1832 = vpow2.f32 %v816_v6 }
 0x2da   :  { %v1827_v2 = vpop.eup %1826 }
 0x2db   :  { %v552_v16 = vsel %vm429_vm0, %v1827_v2, 0.0  ;;  %v1829_v9 = vpop.eup %1828  ;;  %v558_v24 = vpack.c.bf16 %v1827_v2, %v2258_v7  ;;  %1163 = vmatpush.bf16.msra.mxu1 %v2300_v22  ;;  %v2318_v7 = vpack.c.bf16 %v2128_v0, %v2124_v63 }
 0x2dc   :  { %837 = vadd.xlane.f32.xlu1 %v836_v39  ;;  %553 = vadd.xlane.f32.xlu0 %v552_v16  ;;  %v609_v37 = vmul.f32 %v1829_v9, %v582_v17 }
 0x2de   :  { %v1831_v13 = vpop.eup %1830  ;;  %1271 = vrot.lane.b32.xlu2 %v2173_v46, %s2035_s6  ;;  %v2309_v46 = vpack.c.bf16 %v2266_v11, %v2263_v8  ;;  %v279_v8 = vpop.f32.mrf.mxu0  ;;  %v2327_v11 = vpack.c.bf16 %v2122_v61, %v2119_v57 }
 0x2df   :  { %v608_v18 = vmul.f32 %v1831_v13, %v580_v5  ;;  %v1833_v20 = vpop.eup %1832 }
 0x2e0   :  { %v845_v25 = vpack.c.bf16 %v1833_v20, %v1825_v54  ;;  %1164 = vmatpush.bf16.msra.mxu1 %v2309_v46  ;;  %v839_v15 = vsel %vm429_vm0, %v1833_v20, 0.0 }
 0x2e1   :  { %v616_v19 = vpack.c.bf16 %v609_v37, %v608_v18 }
 0x2e3   :  { %1683 = vmatmul.msk.bf16.vlgmr.msrb.gmra.mxu0 %vm429_vm0, %v616_v19 }
 0x2e4   :  { %834 = vadd.xlane.f32.xlu0 %v833_v23  ;;  %1501 = vmatpush.bf16.msrb.mxu1 %v1770_v21 }
 0x2e5   :  { %1666 = vmatmul.msk.bf16.gmra.mxu3 %vm429_vm0, %v558_v24  ;;  %1694 = vmatmul.msk.bf16.gmra.mxu2 %vm429_vm0, %v845_v25 }
 0x2e6   :  { %v281_v63 = vpop.f32.mrf.mxu0 }
 0x2e7   :  { %v2331_v0 = vpack.c.bf16 %v281_v63, %v279_v8 }
 0x2e9   :  { %1259 = vrot.lane.b32.xlu2 %v2331_v0, %s2035_s6 }
 0x2ec   :  { %840 = vadd.xlane.f32.xlu0 %v839_v15 }
 0x2ee   :  { %v284_v57 = vpop.f32.mrf.mxu0 }
 0x2f5   :  { %1275 = vrot.lane.b32.xlu1 %v2163_v41, %s2035_s6  ;;  %v1769_v41 = vld [vmem:[#allocation7 + $0x30] sm:$0xff] }
 0x2f6   :  { %964 = vmatpush.bf16.msrb.mxu3 %v1769_v41  ;;  %1502 = vmatpush.bf16.msrb.mxu1 %v1769_v41  ;;  %v286_v59 = vpop.f32.mrf.mxu0 }
 0x2f7   :  { %v2336_v28 = vpack.c.bf16 %v286_v59, %v284_v57 }
 0x2f9   :  { %1261 = vrot.lane.b32.xlu2 %v2336_v28, %s2035_s6 }
 0x2fd   :  { %1265 = vrot.lane.b32.xlu1 %v2318_v7, %s2035_s6 }
 0x300   :  { %1273 = vrot.lane.b32.xlu0 %v2169_v44, %s2035_s6  ;;  %v1768_v44 = vld [vmem:[#allocation7 + $0x28] sm:$0xff] }
 0x301   :  { %965 = vmatpush.bf16.msrb.mxu3 %v1768_v44  ;;  %1503 = vmatpush.bf16.msrb.mxu1 %v1768_v44 }
 0x305   :  { %1418 = vrot.lane.b32.xlu1 %v1015_v4, %s2035_s6  ;;  %966 = vmatpush.bf16.msrb.mxu3 %v1767_v27 }
 0x306   :  { %1504 = vmatpush.bf16.msrb.mxu1 %v1767_v27 }
 0x308   :  { %1263 = vrot.lane.b32.xlu0 %v2327_v11, %s2035_s6 }
 0x30d   :  { %v883_v38 = vpop.f32.mrf.mxu2 }
 0x30e   :  { %v548_v61 = vpop.xlane.xlu2 %547 }
 0x310   :  { %1416 = vrot.lane.b32.xlu0 %v1014_v62, %s2035_s6 }
 0x315   :  { %v885_v29 = vpop.f32.mrf.mxu2 }
 0x316   :  { %v823_v30 = vpop.xlane.xlu2 %822  ;;  %v551_v45 = vpop.xlane.xlu1 %550 }
 0x317   :  { %1834 = vrcp.f32 %v823_v30 }
 0x318   :  { %1836 = vrcp.f32 %v539_v42 }
 0x31d   :  { %v1835_v12 = vpop.eup %1834 }
 0x31e   :  { %v829_v33 = vpop.xlane.xlu1 %828  ;;  %v1837_v49 = vpop.eup %1836  ;;  %v912_v56 = vmul.f32 %v1835_v12, %v885_v29 }
 0x331   :  { %v826_v34 = vpop.xlane.xlu2 %825 }
 0x337   :  { %v542_v55 = vpop.xlane.xlu0 %541 }
 0x339   :  { %v1278_v40 = vpop.permute.xlu2 %1277 }
 0x33a   :  { %v1301_v26 = vsel %vm429_vm0, %v1278_v40, 0 }
 0x33b   :  { %1307 = vmatpush.bf16.xpose.msra.mxu3 %v1301_v26 }
 0x33f   :  { %v545_v43 = vpop.xlane.xlu0 %544 }
 0x341   :  { %v1272_v42 = vpop.permute.xlu2 %1271 }
 0x342   :  { %v888_v48 = vpop.f32.mrf.mxu2 }
 0x347   :  { %v820_v3 = vpop.xlane.xlu0 %819  ;;  %v832_v1 = vpop.xlane.xlu1 %831 }
 0x348   :  { %v585_v47 = vpop.f32.mrf.mxu3  ;;  %1838 = vrcp.f32 %v820_v3 }
 0x349   :  { %1840 = vrcp.f32 %v542_v55  ;;  %v610_v10 = vmul.f32 %v1837_v49, %v585_v47 }
 0x34a   :  { %v890_v32 = vpop.f32.mrf.mxu2  ;;  %1842 = vrcp.f32 %v829_v33 }
 0x34b   :  { %1844 = vrcp.f32 %v548_v61 }
 0x34c   :  { %1846 = vrcp.f32 %v826_v34 }
 0x34d   :  { %1848 = vrcp.f32 %v545_v43 }
 0x34e   :  { %v1839_v51 = vpop.eup %1838 }
 0x34f   :  { %v1841_v53 = vpop.eup %1840  ;;  %v911_v50 = vmul.f32 %v1839_v51, %v883_v38  ;;  %v554_v5 = vpop.xlane.xlu0 %553 }
 0x350   :  { %v587_v52 = vpop.f32.mrf.mxu3  ;;  %v1843_v31 = vpop.eup %1842 }
 0x351   :  { %v611_v58 = vmul.f32 %v1841_v53, %v587_v52  ;;  %v919_v14 = vpack.c.bf16 %v912_v56, %v911_v50  ;;  %v1845_v6 = vpop.eup %1844  ;;  %v914_v2 = vmul.f32 %v1843_v31, %v890_v32  ;;  %v838_v39 = vpop.xlane.xlu1 %837  ;;  %v2366_v50 = vld [vmem:[%s2497_s3] ss:$0 sm:$0xff]  ;;  %s2037_s3 = smov [#allocation8]  }
 0x352   :  { %v1847_v36 = vpop.eup %1846  ;;  %v1260_v51 = vpop.permute.xlu2 %1259  ;;  %s1547_s9 = sshll.u32 %s2037_s3, 4  ;;  %s1548_s9 = int_to_ptr.vmem [resolvable:$true] %s1547_s9 }
 0x353   :  { %v617_v60 = vpack.c.bf16 %v611_v58, %v610_v10  ;;  %1711 = vmatmul.msk.bf16.vlgmr.msrb.gmra.mxu3 %vm429_vm0, %v919_v14  ;;  %v1849_v16 = vpop.eup %1848  ;;  %v913_v4 = vmul.f32 %v1847_v36, %v888_v48 }
 0x355   :  { %1684 = vmatmul.msk.bf16.gmra.mxu0 %vm429_vm0, %v617_v60  ;;  %v920_v37 = vpack.c.bf16 %v914_v2, %v913_v4 }
 0x357   :  { %v835_v9 = vpop.xlane.xlu0 %834 }
 0x358   :  { %v590_v35 = vpop.f32.mrf.mxu3  ;;  %v893_v54 = vpop.f32.mrf.mxu2  ;;  %1850 = vrcp.f32 %v835_v9 }
 0x359   :  { %v612_v13 = vmul.f32 %v1849_v16, %v590_v35  ;;  %1852 = vrcp.f32 %v551_v45  ;;  %v1292_v45 = vsel %vm429_vm0, %v1272_v42, 0 }
 0x35a   :  { %1854 = vrcp.f32 %v832_v1  ;;  %v1262_v53 = vpop.permute.xlu2 %1261 }
 0x35b   :  { %1856 = vrcp.f32 %v554_v5 }
 0x35e   :  { %v1851_v15 = vpop.eup %1850 }
 0x35f   :  { %v841_v25 = vpop.xlane.xlu0 %840  ;;  %v1853_v21 = vpop.eup %1852 }
 0x360   :  { %v592_v62 = vpop.f32.mrf.mxu3  ;;  %v895_v19 = vpop.f32.mrf.mxu2  ;;  %1858 = vrcp.f32 %v841_v25 }
 0x361   :  { %v613_v17 = vmul.f32 %v1845_v6, %v592_v62  ;;  %v916_v8 = vmul.f32 %v1851_v15, %v895_v19  ;;  %v1855_v63 = vpop.eup %1854  ;;  %1860 = vrcp.f32 %v838_v39  ;;  %v665_v56 = vpop.f32.mrf.mxu0 }
 0x362   :  { %v1857_v41 = vpop.eup %1856  ;;  %v915_v44 = vmul.f32 %v1855_v63, %v893_v54  ;;  %v685_v52 = vadd.f32 %v2366_v50, %v665_v56 }
 0x363   :  { %v618_v18 = vpack.c.bf16 %v613_v17, %v612_v13  ;;  %1712 = vmatmul.msk.bf16.gmra.mxu3 %vm429_vm0, %v920_v37 }
 0x364   :  { %v921_v34 = vpack.c.bf16 %v916_v8, %v915_v44 }
 0x365   :  { %1685 = vmatmul.msk.bf16.gmra.mxu0 %vm429_vm0, %v618_v18 }
 0x366   :  { %v1859_v3 = vpop.eup %1858 }
 0x367   :  { %v1276_v20 = vpop.permute.xlu1 %1275  ;;  %v1861_v48 = vpop.eup %1860 }
 0x368   :  { %v1298_v23 = vsel %vm429_vm0, %v1276_v20, 0  ;;  %v595_v24 = vpop.f32.mrf.mxu3  ;;  %v898_v59 = vpop.f32.mrf.mxu2 }
 0x369   :  { %1308 = vmatpush.bf16.xpose.msra.mxu3 %v1298_v23  ;;  %v614_v61 = vmul.f32 %v1853_v21, %v595_v24  ;;  %v917_v12 = vmul.f32 %v1861_v48, %v898_v59 }
 0x36f   :  { %v1266_v27 = vpop.permute.xlu1 %1265 }
 0x370   :  { %v597_v57 = vpop.f32.mrf.mxu3  ;;  %v900_v29 = vpop.f32.mrf.mxu2 }
 0x371   :  { %v615_v30 = vmul.f32 %v1857_v41, %v597_v57  ;;  %v918_v47 = vmul.f32 %v1859_v3, %v900_v29 }
 0x372   :  { %v1274_v55 = vpop.permute.xlu0 %1273 }
 0x373   :  { %v619_v38 = vpack.c.bf16 %v615_v30, %v614_v61  ;;  %v1295_v40 = vsel %vm429_vm0, %v1274_v55, 0  ;;  %1713 = vmatmul.msk.bf16.gmra.mxu3 %vm429_vm0, %v921_v34  ;;  %v922_v33 = vpack.c.bf16 %v918_v47, %v917_v12 }
 0x374   :  { %1309 = vmatpush.bf16.xpose.msra.mxu3 %v1295_v40 }
 0x375   :  { %1686 = vmatmul.msk.bf16.gmra.mxu0 %vm429_vm0, %v619_v38 }
 0x377   :  { %v1419_v26 = vpop.permute.xlu1 %1418 }
 0x378   :  { %1440 = vmatpush.bf16.msrb.mxu0 %v1419_v26 }
 0x37a   :  { %v1264_v43 = vpop.permute.xlu0 %1263 }
 0x37c   :  { %1310 = vmatpush.bf16.xpose.msra.mxu3 %v1292_v45 }
 0x382   :  { %v1417_v49 = vpop.permute.xlu0 %1416 }
 0x383   :  { %1441 = vmatpush.bf16.msrb.mxu0 %v1417_v49  ;;  %1714 = vmatmul.msk.bf16.gmra.mxu3 %vm429_vm0, %v922_v33 }
 0x385   :  { %1715 = vmatmul.msk.bf16.vlgmr.msra.gmra.mxu0 %vm429_vm0, %v2331_v0  ;;  %v667_v0 = vpop.f32.mrf.mxu0 }
 0x386   :  { %v686_v14 = vadd.f32 %v2366_v50, %v667_v0 }
 0x393   :  { %1727 = vmatmul.msk.bf16.vlgmr.msra.gmra.mxu3 %vm429_vm0, %v1260_v51 }
 0x395   :  { %1716 = vmatmul.msk.bf16.gmra.mxu0 %vm429_vm0, %v2336_v28 }
 0x3a3   :  { %1728 = vmatmul.msk.bf16.gmra.mxu3 %vm429_vm0, %v1262_v53 }
 0x3a5   :  { %1717 = vmatmul.msk.bf16.gmra.mxu0 %vm429_vm0, %v2327_v11 }
 0x3b3   :  { %1729 = vmatmul.msk.bf16.gmra.mxu3 %vm429_vm0, %v1264_v43 }
 0x3b5   :  { %1718 = vmatmul.msk.bf16.gmra.mxu0 %vm429_vm0, %v2318_v7 }
 0x3c3   :  { %1730 = vmatmul.msk.bf16.gmra.mxu3 %vm429_vm0, %v1266_v27 }
 0x3d2   :  { %v670_v28 = vpop.f32.mrf.mxu0 }
 0x3d3   :  { %v687_v32 = vadd.f32 %v2366_v50, %v670_v28 }
 0x3d6   :  { %v968_v10 = vpop.f32.mrf.mxu3 }
 0x3d7   :  { %v988_v58 = vadd.f32 %v968_v10, %v685_v52 }
 0x3d9   :  { %996 = vst [vmem:[#allocation8] sm:$0xff] %v988_v58 }
 0x3da   :  { %v672_v11 = vpop.f32.mrf.mxu0 }
 0x3db   :  { %v688_v54 = vadd.f32 %v2366_v50, %v672_v11 }
 0x3de   :  { %v970_v60 = vpop.f32.mrf.mxu3 }
 0x3df   :  { %v989_v7 = vadd.f32 %v970_v60, %v686_v14 }
 0x3e1   :  { %997 = vst [vmem:[#allocation8 + $0x8] sm:$0xff] %v989_v7 }
 0x3e2   :  { %v675_v1 = vpop.f32.mrf.mxu0 }
 0x3e3   :  { %v689_v39 = vadd.f32 %v2366_v50, %v675_v1 }
 0x3e6   :  { %v973_v5 = vpop.f32.mrf.mxu3 }
 0x3e7   :  { %v990_v35 = vadd.f32 %v973_v5, %v687_v32 }
 0x3e9   :  { %998 = vst [vmem:[#allocation8 + $0x10] sm:$0xff] %v990_v35 }
 0x3ea   :  { %v677_v31 = vpop.f32.mrf.mxu0 }
 0x3eb   :  { %v690_v62 = vadd.f32 %v2366_v50, %v677_v31 }
 0x3ee   :  { %v975_v6 = vpop.f32.mrf.mxu3 }
 0x3ef   :  { %v991_v2 = vadd.f32 %v975_v6, %v688_v54 }
 0x3f1   :  { %999 = vst [vmem:[#allocation8 + $0x18] sm:$0xff] %v991_v2 }
 0x3f2   :  { %v680_v36 = vpop.f32.mrf.mxu0 }
 0x3f3   :  { %v691_v19 = vadd.f32 %v2366_v50, %v680_v36 }
 0x3f6   :  { %v978_v16 = vpop.f32.mrf.mxu3 }
 0x3f7   :  { %v992_v4 = vadd.f32 %v978_v16, %v689_v39 }
 0x3f9   :  { %1000 = vst [vmem:[#allocation8 + $0x20] sm:$0xff] %v992_v4 }
 0x3fa   :  { %v682_v9 = vpop.f32.mrf.mxu0 }
 0x3fb   :  { %v692_v15 = vadd.f32 %v2366_v50, %v682_v9 }
 0x3fe   :  { %v980_v13 = vpop.f32.mrf.mxu3 }
 0x3ff   :  { %v993_v17 = vadd.f32 %v980_v13, %v690_v62 }
 0x401   :  { %1001 = vst [vmem:[#allocation8 + $0x28] sm:$0xff] %v993_v17 }
 0x402   :  { %v1049_v37 = vpop.f32.mrf.mxu0 }
 0x403   :  { %v1069_v18 = vsel %vm429_vm0, %v1049_v37, -inf }
 0x404   :  { %1070 = vmax.xlane.f32.xlu2 %v1069_v18 }
 0x406   :  { %v983_v20 = vpop.f32.mrf.mxu3 }
 0x407   :  { %v994_v23 = vadd.f32 %v983_v20, %v691_v19 }
 0x409   :  { %1002 = vst [vmem:[#allocation8 + $0x30] sm:$0xff] %v994_v23 }
 0x40a   :  { %v1051_v24 = vpop.f32.mrf.mxu0 }
 0x40b   :  { %v1072_v25 = vsel %vm429_vm0, %v1051_v24, -inf }
 0x40c   :  { %1073 = vmax.xlane.f32.xlu0 %v1072_v25 }
 0x40e   :  { %v985_v21 = vpop.f32.mrf.mxu3 }
 0x40f   :  { %v995_v8 = vadd.f32 %v985_v21, %v692_v15 }
 0x411   :  { %1003 = vst [vmem:[#allocation8 + $0x38] sm:$0xff] %v995_v8 }
 0x412   :  { %v2378_v63 = vpop.f32.mrf.mxu0 }
 0x413   :  { %v1075_v59 = vsel %vm429_vm0, %v2378_v63, -inf }
 0x416   :  { %v1312_v41 = vpop.f32.mrf.mxu3 }
 0x417   :  { %v1332_v44 = vsel %vm429_vm0, %v1312_v41, -inf }
 0x418   :  { %1333 = vmax.xlane.f32.xlu1 %v1332_v44 }
 0x41a   :  { %v2381_v27 = vpop.f32.mrf.mxu0 }
 0x41b   :  { %v1078_v34 = vsel %vm429_vm0, %v2381_v27, -inf }
 0x41e   :  { %v2383_v57 = vpop.f32.mrf.mxu3 }
 0x41f   :  { %v1335_v61 = vsel %vm429_vm0, %v2383_v57, -inf }
 0x420   :  { %1412 = vrot.lane.b32.xlu0 %v2309_v46, %s2035_s6  ;;  %1336 = vmax.xlane.f32.xlu2 %v1335_v61 }
 0x421   :  { %1076 = vmax.xlane.f32.xlu1 %v1075_v59 }
 0x422   :  { %v2395_v55 = vpop.f32.mrf.mxu0 }
 0x423   :  { %v1081_v51 = vsel %vm429_vm0, %v2395_v55, -inf }
 0x426   :  { %v2391_v30 = vpop.f32.mrf.mxu3 }
 0x427   :  { %v1338_v38 = vsel %vm429_vm0, %v2391_v30, -inf }
 0x429   :  { %1079 = vmax.xlane.f32.xlu1 %v1078_v34 }
 0x42a   :  { %v2401_v46 = vpop.f32.mrf.mxu0 }
 0x42b   :  { %v1084_v26 = vsel %vm429_vm0, %v2401_v46, -inf }
 0x42e   :  { %v2399_v40 = vpop.f32.mrf.mxu3 }
 0x42f   :  { %v1341_v47 = vsel %vm429_vm0, %v2399_v40, -inf }
 0x431   :  { %1339 = vmax.xlane.f32.xlu1 %v1338_v38 }
 0x432   :  { %v2409_v43 = vpop.f32.mrf.mxu0 }
 0x433   :  { %v1087_v29 = vsel %vm429_vm0, %v2409_v43, -inf }
 0x436   :  { %v2407_v42 = vpop.f32.mrf.mxu3 }
 0x437   :  { %v1344_v3 = vsel %vm429_vm0, %v2407_v42, -inf }
 0x438   :  { %1414 = vrot.lane.b32.xlu2 %v2300_v22, %s2035_s6 }
 0x439   :  { %1085 = vmax.xlane.f32.xlu1 %v1084_v26 }
 0x43a   :  { %v2425_v33 = vpop.f32.mrf.mxu0 }
 0x43b   :  { %v1090_v49 = vsel %vm429_vm0, %v2425_v33, -inf }
 0x43e   :  { %v2413_v45 = vpop.f32.mrf.mxu3 }
 0x43f   :  { %v1347_v48 = vsel %vm429_vm0, %v2413_v45, -inf }
 0x441   :  { %1088 = vmax.xlane.f32.xlu1 %v1087_v29 }
 0x446   :  { %v2419_v22 = vpop.f32.mrf.mxu3 }
 0x447   :  { %v1350_v12 = vsel %vm429_vm0, %v2419_v22, -inf }
 0x449   :  { %1345 = vmax.xlane.f32.xlu1 %v1344_v3 }
 0x44a   :  { %1342 = vmax.xlane.f32.xlu0 %v1341_v47 }
 0x44e   :  { %v2431_v53 = vpop.f32.mrf.mxu3 }
 0x44f   :  { %v1353_v56 = vsel %vm429_vm0, %v2431_v53, -inf }
 0x451   :  { %1348 = vmax.xlane.f32.xlu1 %v1347_v48 }
 0x452   :  { %1351 = vmax.xlane.f32.xlu0 %v1350_v12 }
 0x459   :  { %1091 = vmax.xlane.f32.xlu1 %v1090_v49 }
 0x461   :  { %1082 = vmax.xlane.f32.xlu2 %v1081_v51 }
 0x469   :  { %1354 = vmax.xlane.f32.xlu2 %v1353_v56 }
 0x477   :  { %v1071_v0 = vpop.xlane.xlu2 %1070 }
 0x478   :  { %v1093_v28 = vsub.f32 %v1049_v37, %v1071_v0 }
 0x47a   :  { %v1101_v52 = vmul.f32 1.442695, %v1093_v28 }
 0x47c   :  { %1862 = vpow2.f32 %v1101_v52 }
 0x47f   :  { %v1074_v10 = vpop.xlane.xlu0 %1073 }
 0x480   :  { %v1094_v58 = vsub.f32 %v1051_v24, %v1074_v10 }
 0x482   :  { %v1863_v11 = vpop.eup %1862  ;;  %v1103_v14 = vmul.f32 1.442695, %v1094_v58 }
 0x483   :  { %v1117_v60 = vsel %vm429_vm0, %v1863_v11, 0.0 }
 0x484   :  { %1864 = vpow2.f32 %v1103_v14  ;;  %1118 = vadd.xlane.f32.xlu1 %v1117_v60 }
 0x48a   :  { %v1865_v7 = vpop.eup %1864 }
 0x48b   :  { %v1141_v1 = vpack.c.bf16 %v1865_v7, %v1863_v11  ;;  %v1120_v32 = vsel %vm429_vm0, %v1865_v7, 0.0  ;;  %v1334_v5 = vpop.xlane.xlu1 %1333 }
 0x48c   :  { %1121 = vadd.xlane.f32.xlu0 %v1120_v32  ;;  %v1356_v35 = vsub.f32 %v1312_v41, %v1334_v5 }
 0x48d   :  { %1719 = vmatmul.msk.bf16.vlgmr.msra.gmra.mxu1 %vm429_vm0, %v1141_v1 }
 0x48e   :  { %v1364_v31 = vmul.f32 1.442695, %v1356_v35 }
 0x490   :  { %1866 = vpow2.f32 %v1364_v31 }
 0x492   :  { %v1413_v20 = vpop.permute.xlu0 %1412 }
 0x493   :  { %v1337_v54 = vpop.xlane.xlu2 %1336 }
 0x494   :  { %v1077_v6 = vpop.xlane.xlu1 %1076  ;;  %v1357_v2 = vsub.f32 %v2383_v57, %v1337_v54 }
 0x495   :  { %v1095_v36 = vsub.f32 %v2378_v63, %v1077_v6 }
 0x496   :  { %v1867_v39 = vpop.eup %1866  ;;  %v1366_v16 = vmul.f32 1.442695, %v1357_v2 }
 0x497   :  { %v1105_v4 = vmul.f32 1.442695, %v1095_v36  ;;  %v1380_v9 = vsel %vm429_vm0, %v1867_v39, 0.0 }
 0x498   :  { %1868 = vpow2.f32 %v1366_v16  ;;  %1381 = vadd.xlane.f32.xlu2 %v1380_v9 }
 0x499   :  { %1870 = vpow2.f32 %v1105_v4 }
 0x49b   :  { %v1415_v62 = vpop.permute.xlu2 %1414 }
 0x49c   :  { %v1080_v13 = vpop.xlane.xlu1 %1079  ;;  %1442 = vmatpush.bf16.msrb.mxu0 %v1415_v62 }
 0x49d   :  { %v1096_v17 = vsub.f32 %v2381_v27, %v1080_v13 }
 0x49e   :  { %v1869_v37 = vpop.eup %1868 }
 0x49f   :  { %v1107_v18 = vmul.f32 1.442695, %v1096_v17  ;;  %v1871_v19 = vpop.eup %1870  ;;  %v1383_v23 = vsel %vm429_vm0, %v1869_v37, 0.0  ;;  %v1404_v25 = vpack.c.bf16 %v1869_v37, %v1867_v39 }
 0x4a0   :  { %1443 = vmatpush.bf16.msrb.mxu0 %v1413_v20  ;;  %v1123_v24 = vsel %vm429_vm0, %v1871_v19, 0.0  ;;  %1384 = vadd.xlane.f32.xlu1 %v1383_v23 }
 0x4a1   :  { %1872 = vpow2.f32 %v1107_v18  ;;  %1124 = vadd.xlane.f32.xlu0 %v1123_v24 }
 0x4a3   :  { %1731 = vmatmul.msk.bf16.vlgmr.msrb.gmra.mxu0 %vm429_vm0, %v1404_v25 }
 0x4a4   :  { %v1340_v15 = vpop.xlane.xlu1 %1339 }
 0x4a5   :  { %v1358_v21 = vsub.f32 %v2391_v30, %v1340_v15 }
 0x4a7   :  { %v1873_v8 = vpop.eup %1872  ;;  %v1368_v63 = vmul.f32 1.442695, %v1358_v21 }
 0x4a8   :  { %v1126_v41 = vsel %vm429_vm0, %v1873_v8, 0.0  ;;  %v1142_v44 = vpack.c.bf16 %v1873_v8, %v1871_v19 }
 0x4a9   :  { %1874 = vpow2.f32 %v1368_v63  ;;  %1127 = vadd.xlane.f32.xlu2 %v1126_v41 }
 0x4aa   :  { %1720 = vmatmul.msk.bf16.gmra.mxu1 %vm429_vm0, %v1142_v44 }
 0x4ac   :  { %v1086_v27 = vpop.xlane.xlu1 %1085 }
 0x4ad   :  { %v1098_v57 = vsub.f32 %v2401_v46, %v1086_v27 }
 0x4af   :  { %v1875_v61 = vpop.eup %1874  ;;  %v1111_v59 = vmul.f32 1.442695, %v1098_v57 }
 0x4b0   :  { %v1386_v34 = vsel %vm429_vm0, %v1875_v61, 0.0 }
 0x4b1   :  { %1876 = vpow2.f32 %v1111_v59  ;;  %1387 = vadd.xlane.f32.xlu1 %v1386_v34 }
 0x4b4   :  { %v1089_v38 = vpop.xlane.xlu1 %1088 }
 0x4b5   :  { %v1099_v30 = vsub.f32 %v2409_v43, %v1089_v38 }
 0x4b7   :  { %v1877_v26 = vpop.eup %1876  ;;  %v1113_v29 = vmul.f32 1.442695, %v1099_v30 }
 0x4b8   :  { %v1132_v3 = vsel %vm429_vm0, %v1877_v26, 0.0 }
 0x4b9   :  { %1878 = vpow2.f32 %v1113_v29  ;;  %1133 = vadd.xlane.f32.xlu1 %v1132_v3 }
 0x4bc   :  { %v1346_v47 = vpop.xlane.xlu1 %1345 }
 0x4bd   :  { %v1343_v48 = vpop.xlane.xlu0 %1342  ;;  %v1360_v49 = vsub.f32 %v2407_v42, %v1346_v47 }
 0x4be   :  { %v1359_v12 = vsub.f32 %v2399_v40, %v1343_v48 }
 0x4bf   :  { %v1879_v46 = vpop.eup %1878  ;;  %v1372_v0 = vmul.f32 1.442695, %v1360_v49 }
 0x4c0   :  { %v1370_v51 = vmul.f32 1.442695, %v1359_v12  ;;  %v1135_v56 = vsel %vm429_vm0, %v1879_v46, 0.0 }
 0x4c1   :  { %1136 = vadd.xlane.f32.xlu1 %v1135_v56 }
 0x4c2   :  { %1880 = vpow2.f32 %v1370_v51 }
 0x4c3   :  { %1882 = vpow2.f32 %v1372_v0 }
 0x4c4   :  { %v1349_v43 = vpop.xlane.xlu1 %1348 }
 0x4c5   :  { %v1361_v52 = vsub.f32 %v2413_v45, %v1349_v43  ;;  %v1352_v45 = vpop.xlane.xlu0 %1351 }
 0x4c6   :  { %v1362_v54 = vsub.f32 %v2419_v22, %v1352_v45 }
 0x4c7   :  { %v1374_v40 = vmul.f32 1.442695, %v1361_v52 }
 0x4c8   :  { %v1881_v28 = vpop.eup %1880 }
 0x4c9   :  { %v1389_v10 = vsel %vm429_vm0, %v1881_v28, 0.0  ;;  %v1405_v58 = vpack.c.bf16 %v1881_v28, %v1875_v61  ;;  %v1883_v14 = vpop.eup %1882  ;;  %1884 = vpow2.f32 %v1374_v40 }
 0x4ca   :  { %1390 = vadd.xlane.f32.xlu0 %v1389_v10  ;;  %v1392_v7 = vsel %vm429_vm0, %v1883_v14, 0.0 }
 0x4cb   :  { %1732 = vmatmul.msk.bf16.gmra.mxu0 %vm429_vm0, %v1405_v58 }
 0x4cc   :  { %v1092_v11 = vpop.xlane.xlu1 %1091 }
 0x4cd   :  { %v1100_v42 = vsub.f32 %v2425_v33, %v1092_v11  ;;  %v1376_v33 = vmul.f32 1.442695, %v1362_v54 }
 0x4cf   :  { %v1115_v60 = vmul.f32 1.442695, %v1100_v42  ;;  %v1885_v32 = vpop.eup %1884 }
 0x4d0   :  { %v1406_v2 = vpack.c.bf16 %v1885_v32, %v1883_v14  ;;  %v1395_v13 = vsel %vm429_vm0, %v1885_v32, 0.0 }
 0x4d1   :  { %1886 = vpow2.f32 %v1115_v60 }
 0x4d2   :  { %1393 = vadd.xlane.f32.xlu0 %v1392_v7 }
 0x4d4   :  { %v1083_v1 = vpop.xlane.xlu2 %1082 }
 0x4d5   :  { %v1097_v5 = vsub.f32 %v2395_v55, %v1083_v1 }
 0x4d7   :  { %v1887_v35 = vpop.eup %1886  ;;  %v1109_v31 = vmul.f32 1.442695, %v1097_v5 }
 0x4d8   :  { %v1138_v6 = vsel %vm429_vm0, %v1887_v35, 0.0  ;;  %v1144_v18 = vpack.c.bf16 %v1887_v35, %v1879_v46 }
 0x4d9   :  { %1888 = vpow2.f32 %v1109_v31 }
 0x4da   :  { %1139 = vadd.xlane.f32.xlu0 %v1138_v6  ;;  %1890 = vpow2.f32 %v1376_v33 }
 0x4db   :  { %1733 = vmatmul.msk.bf16.gmra.mxu0 %vm429_vm0, %v1406_v2 }
 0x4dc   :  { %v1355_v36 = vpop.xlane.xlu2 %1354 }
 0x4dd   :  { %v1363_v39 = vsub.f32 %v2431_v53, %v1355_v36 }
 0x4df   :  { %v1889_v16 = vpop.eup %1888  ;;  %v1378_v4 = vmul.f32 1.442695, %v1363_v39 }
 0x4e0   :  { %v1129_v55 = vsel %vm429_vm0, %v1889_v16, 0.0  ;;  %v1143_v9 = vpack.c.bf16 %v1877_v26, %v1889_v16  ;;  %v1891_v22 = vpop.eup %1890 }
 0x4e1   :  { %1892 = vpow2.f32 %v1378_v4  ;;  %1130 = vadd.xlane.f32.xlu2 %v1129_v55  ;;  %v1398_v53 = vsel %vm429_vm0, %v1891_v22, 0.0 }
 0x4e2   :  { %1721 = vmatmul.msk.bf16.gmra.mxu1 %vm429_vm0, %v1143_v9 }
 0x4e7   :  { %v1893_v62 = vpop.eup %1892 }
 0x4e8   :  { %v1401_v17 = vsel %vm429_vm0, %v1893_v62, 0.0  ;;  %v1407_v37 = vpack.c.bf16 %v1893_v62, %v1891_v22 }
 0x4e9   :  { %1396 = vadd.xlane.f32.xlu2 %v1395_v13  ;;  %1402 = vadd.xlane.f32.xlu1 %v1401_v17 }
 0x4eb   :  { %1734 = vmatmul.msk.bf16.gmra.mxu0 %vm429_vm0, %v1407_v37 }
 0x4f1   :  { %1399 = vadd.xlane.f32.xlu2 %v1398_v53 }
 0x4f2   :  { %1722 = vmatmul.msk.bf16.gmra.mxu1 %vm429_vm0, %v1144_v18 }
 0x4f7   :  { %v1119_v19 = vpop.xlane.xlu1 %1118 }
 0x4f8   :  { %1894 = vrcp.f32 %v1119_v19 }
 0x4fe   :  { %v1895_v24 = vpop.eup %1894 }
 0x4ff   :  { %v1122_v20 = vpop.xlane.xlu0 %1121 }
 0x500   :  { %1896 = vrcp.f32 %v1122_v20 }
 0x506   :  { %v1897_v25 = vpop.eup %1896 }
 0x50a   :  { %v1166_v23 = vpop.f32.mrf.mxu1 }
 0x50b   :  { %v1194_v21 = vmul.f32 %v1895_v24, %v1166_v23  ;;  %v1382_v41 = vpop.xlane.xlu2 %1381 }
 0x50c   :  { %1898 = vrcp.f32 %v1382_v41 }
 0x512   :  { %v1168_v15 = vpop.f32.mrf.mxu1  ;;  %v1899_v34 = vpop.eup %1898 }
 0x513   :  { %v1195_v8 = vmul.f32 %v1897_v25, %v1168_v15  ;;  %v1385_v44 = vpop.xlane.xlu1 %1384 }
 0x514   :  { %1900 = vrcp.f32 %v1385_v44  ;;  %v1125_v57 = vpop.xlane.xlu0 %1124 }
 0x515   :  { %v1202_v63 = vpack.c.bf16 %v1195_v8, %v1194_v21  ;;  %1902 = vrcp.f32 %v1125_v57 }
 0x517   :  { %1723 = vmatmul.msk.bf16.vlgmr.msrb.gmra.mxu2 %vm429_vm0, %v1202_v63 }
 0x51a   :  { %v1901_v38 = vpop.eup %1900 }
 0x51b   :  { %v1903_v47 = vpop.eup %1902 }
 0x51c   :  { %v1128_v61 = vpop.xlane.xlu2 %1127 }
 0x51d   :  { %1904 = vrcp.f32 %v1128_v61 }
 0x520   :  { %v1445_v27 = vpop.f32.mrf.mxu0 }
 0x521   :  { %v1473_v26 = vmul.f32 %v1899_v34, %v1445_v27 }
 0x523   :  { %v1905_v48 = vpop.eup %1904 }
 0x524   :  { %v1388_v56 = vpop.xlane.xlu1 %1387 }
 0x525   :  { %1906 = vrcp.f32 %v1388_v56 }
 0x527   :  { %v1171_v59 = vpop.f32.mrf.mxu1 }
 0x528   :  { %v1447_v30 = vpop.f32.mrf.mxu0  ;;  %v1196_v46 = vmul.f32 %v1903_v47, %v1171_v59 }
 0x529   :  { %v1474_v29 = vmul.f32 %v1901_v38, %v1447_v30 }
 0x52b   :  { %v1481_v3 = vpack.c.bf16 %v1474_v29, %v1473_v26  ;;  %v1907_v28 = vpop.eup %1906 }
 0x52c   :  { %v1134_v42 = vpop.xlane.xlu1 %1133 }
 0x52d   :  { %1735 = vmatmul.msk.bf16.vlgmr.msrb.gmra.mxu1 %vm429_vm0, %v1481_v3 }
 0x52f   :  { %v1173_v12 = vpop.f32.mrf.mxu1 }
 0x530   :  { %v1197_v49 = vmul.f32 %v1905_v48, %v1173_v12 }
 0x532   :  { %v1203_v51 = vpack.c.bf16 %v1197_v49, %v1196_v46 }
 0x534   :  { %1724 = vmatmul.msk.bf16.gmra.mxu2 %vm429_vm0, %v1203_v51  ;;  %v1137_v32 = vpop.xlane.xlu1 %1136 }
 0x53d   :  { %v1391_v0 = vpop.xlane.xlu0 %1390 }
 0x53e   :  { %1908 = vrcp.f32 %v1391_v0 }
 0x544   :  { %v1909_v52 = vpop.eup %1908 }
 0x545   :  { %v1394_v7 = vpop.xlane.xlu0 %1393 }
 0x546   :  { %1910 = vrcp.f32 %v1394_v7 }
 0x548   :  { %v1450_v43 = vpop.f32.mrf.mxu0 }
 0x549   :  { %v1475_v58 = vmul.f32 %v1907_v28, %v1450_v43 }
 0x54c   :  { %v1911_v35 = vpop.eup %1910 }
 0x54d   :  { %v1140_v13 = vpop.xlane.xlu0 %1139 }
 0x550   :  { %v1452_v10 = vpop.f32.mrf.mxu0 }
 0x551   :  { %v1476_v40 = vmul.f32 %v1909_v52, %v1452_v10 }
 0x553   :  { %v1482_v11 = vpack.c.bf16 %v1476_v40, %v1475_v58 }
 0x554   :  { %v1131_v14 = vpop.xlane.xlu2 %1130 }
 0x555   :  { %1736 = vmatmul.msk.bf16.gmra.mxu1 %vm429_vm0, %v1482_v11 }
 0x558   :  { %v1455_v60 = vpop.f32.mrf.mxu0 }
 0x559   :  { %v1477_v54 = vmul.f32 %v1911_v35, %v1455_v60 }
 0x55c   :  { %v1397_v1 = vpop.xlane.xlu2 %1396  ;;  %v1403_v33 = vpop.xlane.xlu1 %1402 }
 0x55d   :  { %1912 = vrcp.f32 %v1397_v1 }
 0x55e   :  { %1914 = vrcp.f32 %v1134_v42 }
 0x55f   :  { %v1176_v45 = vpop.f32.mrf.mxu1  ;;  %1916 = vrcp.f32 %v1131_v14 }
 0x560   :  { %v1457_v5 = vpop.f32.mrf.mxu0  ;;  %1918 = vrcp.f32 %v1403_v33 }
 0x563   :  { %v1913_v31 = vpop.eup %1912 }
 0x564   :  { %v1478_v6 = vmul.f32 %v1913_v31, %v1457_v5  ;;  %v1915_v2 = vpop.eup %1914  ;;  %v1400_v9 = vpop.xlane.xlu2 %1399 }
 0x565   :  { %v1917_v39 = vpop.eup %1916  ;;  %1920 = vrcp.f32 %v1400_v9 }
 0x566   :  { %v1483_v36 = vpack.c.bf16 %v1478_v6, %v1477_v54  ;;  %v1198_v55 = vmul.f32 %v1917_v39, %v1176_v45  ;;  %v1919_v53 = vpop.eup %1918  ;;  %1922 = vrcp.f32 %v1137_v32 }
 0x567   :  { %v1178_v16 = vpop.f32.mrf.mxu1  ;;  %1924 = vrcp.f32 %v1140_v13 }
 0x568   :  { %v1460_v4 = vpop.f32.mrf.mxu0  ;;  %v1199_v22 = vmul.f32 %v1915_v2, %v1178_v16  ;;  %1737 = vmatmul.msk.bf16.gmra.mxu1 %vm429_vm0, %v1483_v36 }
 0x56a   :  { %v1204_v62 = vpack.c.bf16 %v1199_v22, %v1198_v55 }
 0x56b   :  { %v1921_v18 = vpop.eup %1920 }
 0x56c   :  { %1725 = vmatmul.msk.bf16.gmra.mxu2 %vm429_vm0, %v1204_v62  ;;  %v1479_v20 = vmul.f32 %v1921_v18, %v1460_v4  ;;  %v1923_v23 = vpop.eup %1922 }
 0x56d   :  { %v1925_v25 = vpop.eup %1924 }
 0x56f   :  { %v1181_v17 = vpop.f32.mrf.mxu1 }
 0x570   :  { %v1462_v37 = vpop.f32.mrf.mxu0  ;;  %v1200_v21 = vmul.f32 %v1923_v23, %v1181_v17 }
 0x571   :  { %v1480_v19 = vmul.f32 %v1919_v53, %v1462_v37 }
 0x573   :  { %v1484_v24 = vpack.c.bf16 %v1480_v19, %v1479_v20 }
 0x577   :  { %v1183_v15 = vpop.f32.mrf.mxu1 }
 0x578   :  { %v1201_v8 = vmul.f32 %v1925_v25, %v1183_v15  ;;  %1738 = vmatmul.msk.bf16.gmra.mxu1 %vm429_vm0, %v1484_v24 }
 0x57a   :  { %v1205_v63 = vpack.c.bf16 %v1201_v8, %v1200_v21 }
 0x57c   :  { %1726 = vmatmul.msk.bf16.gmra.mxu2 %vm429_vm0, %v1205_v63 }
 0x59a   :  { %v1227_v41 = vpop.f32.mrf.mxu2 }
 0x59b   :  { %v1247_v44 = vadd.f32 %v2366_v50, %v1227_v41 }
 0x5a2   :  { %v1229_v61 = vpop.f32.mrf.mxu2 }
 0x5a3   :  { %v1248_v59 = vadd.f32 %v2366_v50, %v1229_v61 }
 0x5aa   :  { %v1506_v27 = vpop.f32.mrf.mxu1 }
 0x5ab   :  { %v1526_v57 = vadd.f32 %v1506_v27, %v1247_v44 }
 0x5ad   :  { %1535 = vst [vmem:[#allocation8 + $0x40] sm:$0xff] %v1526_v57 }
 0x5b2   :  { %v1508_v34 = vpop.f32.mrf.mxu1 }
 0x5b3   :  { %v1527_v38 = vadd.f32 %v1508_v34, %v1248_v59 }
 0x5b5   :  { %1536 = vst [vmem:[#allocation8 + $0x48] sm:$0xff] %v1527_v38 }
 0x5b7   :  { %v1232_v30 = vpop.f32.mrf.mxu2 }
 0x5b8   :  { %v1249_v26 = vadd.f32 %v2366_v50, %v1232_v30 }
 0x5bf   :  { %v1234_v47 = vpop.f32.mrf.mxu2 }
 0x5c0   :  { %v1250_v48 = vadd.f32 %v2366_v50, %v1234_v47 }
 0x5d2   :  { %v1511_v29 = vpop.f32.mrf.mxu1 }
 0x5d3   :  { %v1528_v3 = vadd.f32 %v1511_v29, %v1249_v26 }
 0x5d5   :  { %1537 = vst [vmem:[#allocation8 + $0x50] sm:$0xff] %v1528_v3 }
 0x5da   :  { %v1513_v12 = vpop.f32.mrf.mxu1 }
 0x5db   :  { %v1529_v46 = vadd.f32 %v1513_v12, %v1250_v48 }
 0x5dd   :  { %1538 = vst [vmem:[#allocation8 + $0x58] sm:$0xff] %v1529_v46 }
 0x5e5   :  { %v1516_v49 = vpop.f32.mrf.mxu1 }
 0x5ed   :  { %v1518_v43 = vpop.f32.mrf.mxu1 }
 0x5ef   :  { %v1237_v51 = vpop.f32.mrf.mxu2 }
 0x5f0   :  { %v1251_v56 = vadd.f32 %v2366_v50, %v1237_v51 }
 0x5f2   :  { %v1530_v0 = vadd.f32 %v1516_v49, %v1251_v56 }
 0x5f4   :  { %1539 = vst [vmem:[#allocation8 + $0x60] sm:$0xff] %v1530_v0 }
 0x5f5   :  { %v1521_v58 = vpop.f32.mrf.mxu1 }
 0x5f7   :  { %v1239_v28 = vpop.f32.mrf.mxu2 }
 0x5f8   :  { %v1252_v52 = vadd.f32 %v2366_v50, %v1239_v28 }
 0x5fa   :  { %v1531_v10 = vadd.f32 %v1518_v43, %v1252_v52 }
 0x5fc   :  { %1540 = vst [vmem:[#allocation8 + $0x68] sm:$0xff] %v1531_v10 }
 0x5fd   :  { %v1523_v7 = vpop.f32.mrf.mxu1 }
 0x5ff   :  { %v1242_v40 = vpop.f32.mrf.mxu2 }
 0x600   :  { %v1253_v11 = vadd.f32 %v2366_v50, %v1242_v40 }
 0x602   :  { %v1532_v42 = vadd.f32 %v1521_v58, %v1253_v11 }
 0x604   :  { %1541 = vst [vmem:[#allocation8 + $0x70] sm:$0xff] %v1532_v42 }
 0x607   :  { %v1244_v14 = vpop.f32.mrf.mxu2 }
 0x608   :  { %v1254_v60 = vadd.f32 %v2366_v50, %v1244_v14 }
 0x60a   :  { %v1533_v1 = vadd.f32 %v1523_v7, %v1254_v60 }
 0x60c   :  { %1542 = vst [vmem:[#allocation8 + $0x78] sm:$0xff] %v1533_v1 }
 0x60d   :  { %1555 = dma.vmem_to_hbm [thread:$0]  %s1548_s9, 2048, %s1550_s12, [#allocation4], %s2032_s27, %s2032_s27, %s2033_s28  }
 0x60e   :  { %2026 = dma.done.wait [#allocation4], 2048  }
 0x60f   :  { %2027 = vsyncadd [#allocation4], 4294965248 }
 0x610   :  { %1560 = vsyncpa [#allocation3], 1 }
 0x611   :  { %1561 = vsyncpa [#allocation6], 1 }
 0x612   :  { %1562 = vsyncpa [#allocation4], 1 }

</bundles_post_ra>
